<compile_context>
chip_gen: v7x
topology: tpu7x:2x2x1
jax: 0.10.0
libtpu: 0.0.40
codegen_flags: <defaults>
</compile_context>

<pallas_src>
import functools

import jax
import jax.numpy as jnp
import numpy as np
from jax.experimental import pallas as pl
from jax.experimental.pallas import tpu as pltpu


def _round_up(x, m):
    return ((x + m - 1) // m) * m


def lstm_kernel(score_ref, x_ref, wih_ref, whh_ref, b_ref, wout_ref, bout_ref,
                mask_ref, o_ref, xg_ref, hs_ref, h_ref, c_ref, acc_ref,
                *, hidden_pad, out_dim, seq_len):
    CHUNK = x_ref.shape[0]
    HP = hidden_pad
    OUTP = o_ref.shape[1]
    chunk_i = pl.program_id(0)
    n_chunks = pl.num_programs(0)

    # Initialize the cross-chunk carries on the first grid step.
    @pl.when(chunk_i == 0)
    def _():
        h_ref[...] = jnp.zeros_like(h_ref)
        c_ref[...] = jnp.zeros_like(c_ref)
        acc_ref[...] = jnp.zeros_like(acc_ref)

    score = score_ref[0]

    # embeddings * score, then the batched (CHUNK, E) @ (E, 4HP) input
    # projection for all timesteps of this chunk in one MXU pass (bf16 operands,
    # f32 accumulation) + combined bias b_ih + b_hh.
    x = (x_ref[...] * score).astype(jnp.bfloat16)
    xg_ref[...] = (
        jnp.dot(x, wih_ref[...], preferred_element_type=jnp.float32)
        + b_ref[...]
    )

    def step(t, carry):
        h, c = carry
        # W_hh is read from its VMEM ref inside the loop (bf16, 128x512 = half
        # the f32 vreg footprint) rather than being held live across the loop.
        gates = xg_ref[pl.ds(t, 1), :] + jnp.dot(
            h.astype(jnp.bfloat16), whh_ref[...],
            preferred_element_type=jnp.float32)
        # Gate blocks are 128-lane aligned -> whole-vreg slices.
        i_g = jax.nn.sigmoid(gates[:, 0 * HP:1 * HP])
        f_g = jax.nn.sigmoid(gates[:, 1 * HP:2 * HP])
        g_g = jnp.tanh(gates[:, 2 * HP:3 * HP])
        o_g = jax.nn.sigmoid(gates[:, 3 * HP:4 * HP])
        c = f_g * c + i_g * g_g
        h = o_g * jnp.tanh(c)
        # TODO(synk): batch these 1-sublane stores into full (8,128) tiles.
        hs_ref[pl.ds(t, 1), :] = h
        return h, c

    h, c = jax.lax.fori_loop(0, CHUNK, step, (h_ref[...], c_ref[...]),
                             unroll=8)
    h_ref[...] = h
    c_ref[...] = c

    # Hoisted output layer on the whole chunk at once, then dropout and the
    # running temporal sum (padded timesteps have a zero mask row).
    ys = (jnp.dot(hs_ref[...].astype(jnp.bfloat16), wout_ref[...],
                  preferred_element_type=jnp.float32)
          + bout_ref[...])
    ys = ys * mask_ref[...]
    acc_ref[...] += jnp.sum(ys, axis=0, keepdims=True)

    # Finalize: temporal mean + log_softmax over the first `out_dim` lanes.
    @pl.when(chunk_i == n_chunks - 1)
    def _():
        final = acc_ref[...] / jnp.float32(seq_len)          # (1, OUTP)
        lane = jax.lax.broadcasted_iota(jnp.int32, (1, OUTP), 1)
        valid = lane < out_dim
        masked = jnp.where(valid, final, -jnp.inf)
        m = jnp.max(masked, axis=-1, keepdims=True)
        e = jnp.where(valid, jnp.exp(final - m), 0.0)
        lse = m + jnp.log(jnp.sum(e, axis=-1, keepdims=True))
        o_ref[...] = final - lse


def make_dropout_mask(seed, seq_len, out_dim, p=0.5):
    keep = jax.random.bernoulli(jax.random.PRNGKey(seed), 1.0 - p,
                                (seq_len, out_dim))
    return keep.astype(jnp.float32) / jnp.float32(1.0 - p)


def _pad_gate_cols(w, h, hp):
    """(rows, 4h) -> (rows, 4hp) with each [i, f, g, o] block zero-padded."""
    rows = w.shape[0]
    w4 = w.reshape(rows, 4, h)
    w4 = jnp.pad(w4, ((0, 0), (0, 0), (0, hp - h)))
    return w4.reshape(rows, 4 * hp)


def lstm_forward(ids, score, params, *, train=True, seed=0, chunk=256):
    emb = params["embedding"][ids].astype(jnp.float32)  # (T, E) gather — glue.
    T, E = emb.shape
    H = params["w_hh"].shape[0]
    OUT = params["w_out"].shape[1]
    HP = _round_up(H, 128)
    OUTP = _round_up(OUT, 128)

    CHUNK = min(_round_up(T, 8), chunk)
    T_pad = _round_up(T, CHUNK)
    n_chunks = T_pad // CHUNK

    emb = jnp.pad(emb, ((0, T_pad - T), (0, 0)))

    # Pad weights so each gate / the output dim is 128-lane aligned; padded
    # lanes are zero, which keeps the padded h/c entries exactly zero.  MXU
    # operands are cast to bf16 (f32 accumulation in-kernel).
    w_ih = _pad_gate_cols(params["w_ih"], H, HP).astype(jnp.bfloat16)
    w_hh = jnp.pad(_pad_gate_cols(params["w_hh"], H, HP),
                   ((0, HP - H), (0, 0))).astype(jnp.bfloat16)   # (HP, 4HP)
    b = _pad_gate_cols(params["b"], H, HP)                       # (1, 4HP) f32
    w_out = jnp.pad(params["w_out"],
                    ((0, HP - H), (0, OUTP - OUT))).astype(jnp.bfloat16)
    b_out = jnp.pad(params["b_out"], ((0, 0), (0, OUTP - OUT)))

    if train:
        mask = make_dropout_mask(seed, T, OUT)
    else:
        mask = jnp.ones((T, OUT), jnp.float32)
    mask = jnp.pad(mask, ((0, 0), (0, OUTP - OUT)), constant_values=1.0)
    mask = jnp.pad(mask, ((0, T_pad - T), (0, 0)), constant_values=0.0)

    kernel = functools.partial(lstm_kernel, hidden_pad=HP, out_dim=OUT,
                               seq_len=T)

    out = pl.pallas_call(
        kernel,
        out_shape=jax.ShapeDtypeStruct((1, OUTP), jnp.float32),
        grid=(n_chunks,),
        in_specs=[
            pl.BlockSpec(memory_space=pltpu.MemorySpace.SMEM),      # score
            pl.BlockSpec((CHUNK, E), lambda i: (i, 0)),             # emb (streamed)
            pl.BlockSpec((E, 4 * HP), lambda i: (0, 0)),            # w_ih (resident)
            pl.BlockSpec((HP, 4 * HP), lambda i: (0, 0)),           # w_hh (resident)
            pl.BlockSpec((1, 4 * HP), lambda i: (0, 0)),            # b
            pl.BlockSpec((HP, OUTP), lambda i: (0, 0)),             # w_out
            pl.BlockSpec((1, OUTP), lambda i: (0, 0)),              # b_out
            pl.BlockSpec((CHUNK, OUTP), lambda i: (i, 0)),          # dropout mask
        ],
        out_specs=pl.BlockSpec((1, OUTP), lambda i: (0, 0)),
        scratch_shapes=[
            pltpu.VMEM((CHUNK, 4 * HP), jnp.float32),  # per-chunk input projections
            pltpu.VMEM((CHUNK, HP), jnp.float32),      # per-chunk hidden states
            pltpu.VMEM((1, HP), jnp.float32),          # h carry
            pltpu.VMEM((1, HP), jnp.float32),          # c carry
            pltpu.VMEM((1, OUTP), jnp.float32),        # temporal-sum accumulator
        ],
        compiler_params=pltpu.CompilerParams(
            dimension_semantics=("arbitrary",),        # sequential carry over T chunks
            vmem_limit_bytes=32 * 1024 * 1024),        # > v5e's 16 MiB default
    )(
        jnp.asarray([score], jnp.float32),
        emb, w_ih, w_hh, b, w_out, b_out, mask,
    )
    return out[:, :OUT]


def lstm_forward_ref(ids, score, params, dropout_mask=None, bf16_matmul=False):
    """Pure-JAX reference.  bf16_matmul=True mirrors the kernel's bf16-operand /
    f32-accumulate MXU path for a tight structural check; bf16_matmul=False is
    the full-f32 semantic reference."""
    emb = params["embedding"][ids].astype(jnp.float32) * jnp.float32(score)
    H = params["w_hh"].shape[0]

    if bf16_matmul:
        def mm(a, b):
            return jnp.dot(a.astype(jnp.bfloat16), b.astype(jnp.bfloat16),
                           preferred_element_type=jnp.float32)
    else:
        def mm(a, b):
            return jnp.dot(a, b, preferred_element_type=jnp.float32,
                           precision=jax.lax.Precision.HIGHEST)

    xg = mm(emb, params["w_ih"]) + params["b"]

    def step(carry, g_x):
        h, c = carry
        gates = g_x[None, :] + mm(h, params["w_hh"])
        i_g = jax.nn.sigmoid(gates[:, 0:H])
        f_g = jax.nn.sigmoid(gates[:, H:2 * H])
        g_g = jnp.tanh(gates[:, 2 * H:3 * H])
        o_g = jax.nn.sigmoid(gates[:, 3 * H:4 * H])
        c = f_g * c + i_g * g_g
        h = o_g * jnp.tanh(c)
        return (h, c), h[0]

    (_, _), hs = jax.lax.scan(
        step,
        (jnp.zeros((1, H), jnp.float32), jnp.zeros((1, H), jnp.float32)),
        xg)
    y = mm(hs, params["w_out"]) + params["b_out"]          # (T, OUT)
    if dropout_mask is not None:
        y = y * dropout_mask
    final = jnp.mean(y, axis=0, keepdims=True)             # (1, OUT)
    return jax.nn.log_softmax(final, axis=-1)


def init_params(key, n_tokens, embedding_dim, hidden_dim, out_dim):
    ks = jax.random.split(key, 7)
    k = 1.0 / float(np.sqrt(hidden_dim))
    emb = jax.random.normal(ks[0], (n_tokens, embedding_dim), jnp.float32)
    w_ih = jax.random.uniform(ks[1], (embedding_dim, 4 * hidden_dim),
                              jnp.float32, -k, k)
    w_hh = jax.random.uniform(ks[2], (hidden_dim, 4 * hidden_dim),
                              jnp.float32, -k, k)
    b_ih = jax.random.uniform(ks[3], (1, 4 * hidden_dim), jnp.float32, -k, k)
    b_hh = jax.random.uniform(ks[4], (1, 4 * hidden_dim), jnp.float32, -k, k)
    w_out = jax.random.uniform(ks[5], (hidden_dim, out_dim), jnp.float32, -k, k)
    b_out = jax.random.uniform(ks[6], (1, out_dim), jnp.float32, -k, k)
    return dict(embedding=emb, w_ih=w_ih, w_hh=w_hh, b=b_ih + b_hh,
                w_out=w_out, b_out=b_out)


if __name__ == "__main__":
    N_TOKENS = 256
    EMBEDDING_DIM = 128   # small stand-in for 300
    N_HIDDEN = 64         # small stand-in for 100 (padded to 128 in-kernel)
    OUT_DIM = 2
    SEQ_LEN = 8

    key = jax.random.PRNGKey(0)
    pkey, ikey, ikey2 = jax.random.split(key, 3)
    params = init_params(pkey, N_TOKENS, EMBEDDING_DIM, N_HIDDEN, OUT_DIM)
    ids = jax.random.randint(ikey, (SEQ_LEN,), 0, N_TOKENS, dtype=jnp.int32)
    score = 1.5

    # Training-mode forward (dropout active), checked against the bf16-matched
    # JAX reference that uses the identical dropout mask.
    out_train = jax.block_until_ready(
        lstm_forward(ids, score, params, train=True, seed=0))
    assert out_train.shape == (1, OUT_DIM)
    mask = make_dropout_mask(0, SEQ_LEN, OUT_DIM)
    ref_train = jax.block_until_ready(
        lstm_forward_ref(ids, score, params, dropout_mask=mask,
                         bf16_matmul=True))
    np.testing.assert_allclose(np.asarray(out_train), np.asarray(ref_train),
                               rtol=2e-3, atol=2e-3)

    # Eval-mode forward: tight check vs the bf16-matched reference, loose check
    # vs the full-f32 reference (bounds the bf16-operand drift).
    out_eval = jax.block_until_ready(
        lstm_forward(ids, score, params, train=False))
    ref_eval_bf16 = jax.block_until_ready(
        lstm_forward_ref(ids, score, params, bf16_matmul=True))
    np.testing.assert_allclose(np.asarray(out_eval), np.asarray(ref_eval_bf16),
                               rtol=2e-3, atol=2e-3)
    ref_eval_f32 = jax.block_until_ready(
        lstm_forward_ref(ids, score, params, bf16_matmul=False))
    np.testing.assert_allclose(np.asarray(out_eval), np.asarray(ref_eval_f32),
                               rtol=5e-2, atol=5e-2)

    # Multi-chunk path (grid > 1, h/c carry across chunks, padded-tail masking):
    # T=20 with chunk=8 -> 3 grid steps, 4 padded timesteps.
    SEQ_LEN2 = 20
    ids2 = jax.random.randint(ikey2, (SEQ_LEN2,), 0, N_TOKENS, dtype=jnp.int32)
    out_long = jax.block_until_ready(
        lstm_forward(ids2, score, params, train=False, chunk=8))
    ref_long = jax.block_until_ready(
        lstm_forward_ref(ids2, score, params, bf16_matmul=True))
    np.testing.assert_allclose(np.asarray(out_long), np.asarray(ref_long),
                               rtol=2e-3, atol=2e-3)

    print("KERNEL_OK")
</pallas_src>

<mosaic_0001>
module attributes {stable_mosaic.version = 11 : i64} {
  func.func @lstm_kernel(%arg0: i32, %arg1: memref<1xf32, #tpu.memory_space<smem>>, %arg2: memref<8x128xf32, #tpu.memory_space<vmem>>, %arg3: memref<128x512xbf16, #tpu.memory_space<vmem>>, %arg4: memref<128x512xbf16, #tpu.memory_space<vmem>>, %arg5: memref<1x512xf32, #tpu.memory_space<vmem>>, %arg6: memref<128x128xbf16, #tpu.memory_space<vmem>>, %arg7: memref<1x128xf32, #tpu.memory_space<vmem>>, %arg8: memref<8x128xf32, #tpu.memory_space<vmem>>, %arg9: memref<1x128xf32, #tpu.memory_space<vmem>>, %arg10: memref<8x512xf32, #tpu.memory_space<vmem>>, %arg11: memref<8x128xf32, #tpu.memory_space<vmem>>, %arg12: memref<1x128xf32, #tpu.memory_space<vmem>>, %arg13: memref<1x128xf32, #tpu.memory_space<vmem>>, %arg14: memref<1x128xf32, #tpu.memory_space<vmem>>) attributes {dimension_semantics = [#tpu.dimension_semantics<arbitrary>], iteration_bounds = array<i64: 1>, scalar_prefetch = 0 : i64, scratch_operands = 5 : i64, tpu.core_type = #tpu.core_type<tc>, window_params = [{transform_indices = @transform_0, window_bounds = array<i64: 1>}, {transform_indices = @transform_1, window_bounds = array<i64: 8, 128>}, {pipeline_mode = #tpu.pipeline_mode<synchronous>, transform_indices = @transform_2, window_bounds = array<i64: 128, 512>}, {pipeline_mode = #tpu.pipeline_mode<synchronous>, transform_indices = @transform_3, window_bounds = array<i64: 128, 512>}, {pipeline_mode = #tpu.pipeline_mode<synchronous>, transform_indices = @transform_4, window_bounds = array<i64: 1, 512>}, {pipeline_mode = #tpu.pipeline_mode<synchronous>, transform_indices = @transform_5, window_bounds = array<i64: 128, 128>}, {pipeline_mode = #tpu.pipeline_mode<synchronous>, transform_indices = @transform_6, window_bounds = array<i64: 1, 128>}, {transform_indices = @transform_7, window_bounds = array<i64: 8, 128>}, {pipeline_mode = #tpu.pipeline_mode<synchronous>, transform_indices = @transform_8, window_bounds = array<i64: 1, 128>}]} {
    %c0_i32 = arith.constant 0 : i32
    %0 = arith.cmpi eq, %arg0, %c0_i32 : i32
    %1 = arith.extui %0 : i1 to i32
    %c0_i32_0 = arith.constant 0 : i32
    %2 = arith.cmpi ne, %1, %c0_i32_0 : i32
    scf.if %2 {
      %cst_98 = arith.constant 0.000000e+00 : f32
      %299 = vector.broadcast %cst_98 : f32 to vector<1x128xf32>
      %c0_99 = arith.constant 0 : index
      %c0_100 = arith.constant 0 : index
      %300 = vector.load %arg12[%c0_99, %c0_100] : memref<1x128xf32, #tpu.memory_space<vmem>>, vector<1x128xf32>
      tpu.vector_store %arg12[%c0_99, %c0_100], %299 {strides = array<i32>} : memref<1x128xf32, #tpu.memory_space<vmem>>, vector<1x128xf32>,
      %cst_101 = arith.constant 0.000000e+00 : f32
      %301 = vector.broadcast %cst_101 : f32 to vector<1x128xf32>
      %c0_102 = arith.constant 0 : index
      %c0_103 = arith.constant 0 : index
      %302 = vector.load %arg13[%c0_102, %c0_103] : memref<1x128xf32, #tpu.memory_space<vmem>>, vector<1x128xf32>
      tpu.vector_store %arg13[%c0_102, %c0_103], %301 {strides = array<i32>} : memref<1x128xf32, #tpu.memory_space<vmem>>, vector<1x128xf32>,
      %cst_104 = arith.constant 0.000000e+00 : f32
      %303 = vector.broadcast %cst_104 : f32 to vector<1x128xf32>
      %c0_105 = arith.constant 0 : index
      %c0_106 = arith.constant 0 : index
      %304 = vector.load %arg14[%c0_105, %c0_106] : memref<1x128xf32, #tpu.memory_space<vmem>>, vector<1x128xf32>
      tpu.vector_store %arg14[%c0_105, %c0_106], %303 {strides = array<i32>} : memref<1x128xf32, #tpu.memory_space<vmem>>, vector<1x128xf32>,
    } else {
    }
    %c0 = arith.constant 0 : index
    %3 = memref.load %arg1[%c0] : memref<1xf32, #tpu.memory_space<smem>>
    %c0_1 = arith.constant 0 : index
    %c0_2 = arith.constant 0 : index
    %4 = vector.load %arg2[%c0_1, %c0_2] : memref<8x128xf32, #tpu.memory_space<vmem>>, vector<8x128xf32>
    %5 = vector.broadcast %3 : f32 to vector<8x128xf32>
    %6 = arith.mulf %4, %5 : vector<8x128xf32>
    %7 = arith.truncf %6 : vector<8x128xf32> to vector<8x128xbf16>
    %c0_3 = arith.constant 0 : index
    %c0_4 = arith.constant 0 : index
    %8 = vector.load %arg3[%c0_3, %c0_4] : memref<128x512xbf16, #tpu.memory_space<vmem>>, vector<128x512xbf16>
    %cst = arith.constant dense<0.000000e+00> : vector<8x512xf32>
    %9 = tpu.matmul %7, %8, %cst {dimension_numbers = #tpu.dot_dimension_numbers<[1], [0], [0], [1], [0, 0, 1, 1], [], []>} : vector<8x128xbf16>, vector<128x512xbf16>, vector<8x512xf32> -> vector<8x512xf32>
    %c0_5 = arith.constant 0 : index
    %c0_6 = arith.constant 0 : index
    %10 = vector.load %arg5[%c0_5, %c0_6] : memref<1x512xf32, #tpu.memory_space<vmem>>, vector<1x512xf32>
    %11 = vector.broadcast %10 : vector<1x512xf32> to vector<8x512xf32>
    %12 = arith.addf %9, %11 : vector<8x512xf32>
    %c0_7 = arith.constant 0 : index
    %c0_8 = arith.constant 0 : index
    %13 = vector.load %arg10[%c0_7, %c0_8] : memref<8x512xf32, #tpu.memory_space<vmem>>, vector<8x512xf32>
    tpu.vector_store %arg10[%c0_7, %c0_8], %12 {strides = array<i32>} : memref<8x512xf32, #tpu.memory_space<vmem>>, vector<8x512xf32>,
    %c0_9 = arith.constant 0 : index
    %c0_10 = arith.constant 0 : index
    %14 = vector.load %arg12[%c0_9, %c0_10] : memref<1x128xf32, #tpu.memory_space<vmem>>, vector<1x128xf32>
    %c0_11 = arith.constant 0 : index
    %c0_12 = arith.constant 0 : index
    %15 = vector.load %arg13[%c0_11, %c0_12] : memref<1x128xf32, #tpu.memory_space<vmem>>, vector<1x128xf32>
    %c0_i32_13 = arith.constant 0 : i32
    %16 = arith.index_cast %c0_i32_13 : i32 to index
    %c0_14 = arith.constant 0 : index
    %17 = vector.load %arg10[%16, %c0_14] : memref<8x512xf32, #tpu.memory_space<vmem>>, vector<1x512xf32>
    %18 = arith.truncf %14 : vector<1x128xf32> to vector<1x128xbf16>
    %c0_15 = arith.constant 0 : index
    %c0_16 = arith.constant 0 : index
    %19 = vector.load %arg4[%c0_15, %c0_16] : memref<128x512xbf16, #tpu.memory_space<vmem>>, vector<128x512xbf16>
    %cst_17 = arith.constant dense<0.000000e+00> : vector<1x512xf32>
    %20 = tpu.matmul %18, %19, %cst_17 {dimension_numbers = #tpu.dot_dimension_numbers<[1], [0], [0], [1], [0, 0, 1, 1], [], []>} : vector<1x128xbf16>, vector<128x512xbf16>, vector<1x512xf32> -> vector<1x512xf32>
    %21 = arith.addf %17, %20 : vector<1x512xf32>
    %22 = vector.extract_strided_slice %21 {offsets = [0, 0], sizes = [1, 128], strides = [1, 1]} : vector<1x512xf32> to vector<1x128xf32>
    %23 = arith.negf %22 : vector<1x128xf32>
    %24 = math.exp %23 : vector<1x128xf32>
    %cst_18 = arith.constant 1.000000e+00 : f32
    %25 = vector.broadcast %cst_18 : f32 to vector<1x128xf32>
    %26 = arith.addf %25, %24 : vector<1x128xf32>
    %27 = arith.divf %25, %26 : vector<1x128xf32>
    %28 = vector.extract_strided_slice %21 {offsets = [0, 128], sizes = [1, 128], strides = [1, 1]} : vector<1x512xf32> to vector<1x128xf32>
    %29 = arith.negf %28 : vector<1x128xf32>
    %30 = math.exp %29 : vector<1x128xf32>
    %cst_19 = arith.constant 1.000000e+00 : f32
    %31 = vector.broadcast %cst_19 : f32 to vector<1x128xf32>
    %32 = arith.addf %31, %30 : vector<1x128xf32>
    %33 = arith.divf %31, %32 : vector<1x128xf32>
    %34 = vector.extract_strided_slice %21 {offsets = [0, 256], sizes = [1, 128], strides = [1, 1]} : vector<1x512xf32> to vector<1x128xf32>
    %35 = math.tanh %34 : vector<1x128xf32>
    %36 = vector.extract_strided_slice %21 {offsets = [0, 384], sizes = [1, 128], strides = [1, 1]} : vector<1x512xf32> to vector<1x128xf32>
    %37 = arith.negf %36 : vector<1x128xf32>
    %38 = math.exp %37 : vector<1x128xf32>
    %cst_20 = arith.constant 1.000000e+00 : f32
    %39 = vector.broadcast %cst_20 : f32 to vector<1x128xf32>
    %40 = arith.addf %39, %38 : vector<1x128xf32>
    %41 = arith.divf %39, %40 : vector<1x128xf32>
    %42 = arith.mulf %33, %15 : vector<1x128xf32>
    %43 = arith.mulf %27, %35 : vector<1x128xf32>
    %44 = arith.addf %42, %43 : vector<1x128xf32>
    %45 = math.tanh %44 : vector<1x128xf32>
    %46 = arith.mulf %41, %45 : vector<1x128xf32>
    %47 = arith.index_cast %c0_i32_13 : i32 to index
    %c0_21 = arith.constant 0 : index
    %48 = vector.load %arg11[%47, %c0_21] : memref<8x128xf32, #tpu.memory_space<vmem>>, vector<1x128xf32>
    tpu.vector_store %arg11[%47, %c0_21], %46 {strides = array<i32>} : memref<8x128xf32, #tpu.memory_space<vmem>>, vector<1x128xf32>,
    %c1_i32 = arith.constant 1 : i32
    %49 = arith.index_cast %c1_i32 : i32 to index
    %c0_22 = arith.constant 0 : index
    %50 = vector.load %arg10[%49, %c0_22] : memref<8x512xf32, #tpu.memory_space<vmem>>, vector<1x512xf32>
    %51 = arith.truncf %46 : vector<1x128xf32> to vector<1x128xbf16>
    %c0_23 = arith.constant 0 : index
    %c0_24 = arith.constant 0 : index
    %52 = vector.load %arg4[%c0_23, %c0_24] : memref<128x512xbf16, #tpu.memory_space<vmem>>, vector<128x512xbf16>
    %cst_25 = arith.constant dense<0.000000e+00> : vector<1x512xf32>
    %53 = tpu.matmul %51, %52, %cst_25 {dimension_numbers = #tpu.dot_dimension_numbers<[1], [0], [0], [1], [0, 0, 1, 1], [], []>} : vector<1x128xbf16>, vector<128x512xbf16>, vector<1x512xf32> -> vector<1x512xf32>
    %54 = arith.addf %50, %53 : vector<1x512xf32>
    %55 = vector.extract_strided_slice %54 {offsets = [0, 0], sizes = [1, 128], strides = [1, 1]} : vector<1x512xf32> to vector<1x128xf32>
    %56 = arith.negf %55 : vector<1x128xf32>
    %57 = math.exp %56 : vector<1x128xf32>
    %cst_26 = arith.constant 1.000000e+00 : f32
    %58 = vector.broadcast %cst_26 : f32 to vector<1x128xf32>
    %59 = arith.addf %58, %57 : vector<1x128xf32>
    %60 = arith.divf %58, %59 : vector<1x128xf32>
    %61 = vector.extract_strided_slice %54 {offsets = [0, 128], sizes = [1, 128], strides = [1, 1]} : vector<1x512xf32> to vector<1x128xf32>
    %62 = arith.negf %61 : vector<1x128xf32>
    %63 = math.exp %62 : vector<1x128xf32>
    %cst_27 = arith.constant 1.000000e+00 : f32
    %64 = vector.broadcast %cst_27 : f32 to vector<1x128xf32>
    %65 = arith.addf %64, %63 : vector<1x128xf32>
    %66 = arith.divf %64, %65 : vector<1x128xf32>
    %67 = vector.extract_strided_slice %54 {offsets = [0, 256], sizes = [1, 128], strides = [1, 1]} : vector<1x512xf32> to vector<1x128xf32>
    %68 = math.tanh %67 : vector<1x128xf32>
    %69 = vector.extract_strided_slice %54 {offsets = [0, 384], sizes = [1, 128], strides = [1, 1]} : vector<1x512xf32> to vector<1x128xf32>
    %70 = arith.negf %69 : vector<1x128xf32>
    %71 = math.exp %70 : vector<1x128xf32>
    %cst_28 = arith.constant 1.000000e+00 : f32
    %72 = vector.broadcast %cst_28 : f32 to vector<1x128xf32>
    %73 = arith.addf %72, %71 : vector<1x128xf32>
    %74 = arith.divf %72, %73 : vector<1x128xf32>
    %75 = arith.mulf %66, %44 : vector<1x128xf32>
    %76 = arith.mulf %60, %68 : vector<1x128xf32>
    %77 = arith.addf %75, %76 : vector<1x128xf32>
    %78 = math.tanh %77 : vector<1x128xf32>
    %79 = arith.mulf %74, %78 : vector<1x128xf32>
    %80 = arith.index_cast %c1_i32 : i32 to index
    %c0_29 = arith.constant 0 : index
    %81 = vector.load %arg11[%80, %c0_29] : memref<8x128xf32, #tpu.memory_space<vmem>>, vector<1x128xf32>
    tpu.vector_store %arg11[%80, %c0_29], %79 {strides = array<i32>} : memref<8x128xf32, #tpu.memory_space<vmem>>, vector<1x128xf32>,
    %c2_i32 = arith.constant 2 : i32
    %82 = arith.index_cast %c2_i32 : i32 to index
    %c0_30 = arith.constant 0 : index
    %83 = vector.load %arg10[%82, %c0_30] : memref<8x512xf32, #tpu.memory_space<vmem>>, vector<1x512xf32>
    %84 = arith.truncf %79 : vector<1x128xf32> to vector<1x128xbf16>
    %c0_31 = arith.constant 0 : index
    %c0_32 = arith.constant 0 : index
    %85 = vector.load %arg4[%c0_31, %c0_32] : memref<128x512xbf16, #tpu.memory_space<vmem>>, vector<128x512xbf16>
    %cst_33 = arith.constant dense<0.000000e+00> : vector<1x512xf32>
    %86 = tpu.matmul %84, %85, %cst_33 {dimension_numbers = #tpu.dot_dimension_numbers<[1], [0], [0], [1], [0, 0, 1, 1], [], []>} : vector<1x128xbf16>, vector<128x512xbf16>, vector<1x512xf32> -> vector<1x512xf32>
    %87 = arith.addf %83, %86 : vector<1x512xf32>
    %88 = vector.extract_strided_slice %87 {offsets = [0, 0], sizes = [1, 128], strides = [1, 1]} : vector<1x512xf32> to vector<1x128xf32>
    %89 = arith.negf %88 : vector<1x128xf32>
    %90 = math.exp %89 : vector<1x128xf32>
    %cst_34 = arith.constant 1.000000e+00 : f32
    %91 = vector.broadcast %cst_34 : f32 to vector<1x128xf32>
    %92 = arith.addf %91, %90 : vector<1x128xf32>
    %93 = arith.divf %91, %92 : vector<1x128xf32>
    %94 = vector.extract_strided_slice %87 {offsets = [0, 128], sizes = [1, 128], strides = [1, 1]} : vector<1x512xf32> to vector<1x128xf32>
    %95 = arith.negf %94 : vector<1x128xf32>
    %96 = math.exp %95 : vector<1x128xf32>
    %cst_35 = arith.constant 1.000000e+00 : f32
    %97 = vector.broadcast %cst_35 : f32 to vector<1x128xf32>
    %98 = arith.addf %97, %96 : vector<1x128xf32>
    %99 = arith.divf %97, %98 : vector<1x128xf32>
    %100 = vector.extract_strided_slice %87 {offsets = [0, 256], sizes = [1, 128], strides = [1, 1]} : vector<1x512xf32> to vector<1x128xf32>
    %101 = math.tanh %100 : vector<1x128xf32>
    %102 = vector.extract_strided_slice %87 {offsets = [0, 384], sizes = [1, 128], strides = [1, 1]} : vector<1x512xf32> to vector<1x128xf32>
    %103 = arith.negf %102 : vector<1x128xf32>
    %104 = math.exp %103 : vector<1x128xf32>
    %cst_36 = arith.constant 1.000000e+00 : f32
    %105 = vector.broadcast %cst_36 : f32 to vector<1x128xf32>
    %106 = arith.addf %105, %104 : vector<1x128xf32>
    %107 = arith.divf %105, %106 : vector<1x128xf32>
    %108 = arith.mulf %99, %77 : vector<1x128xf32>
    %109 = arith.mulf %93, %101 : vector<1x128xf32>
    %110 = arith.addf %108, %109 : vector<1x128xf32>
    %111 = math.tanh %110 : vector<1x128xf32>
    %112 = arith.mulf %107, %111 : vector<1x128xf32>
    %113 = arith.index_cast %c2_i32 : i32 to index
    %c0_37 = arith.constant 0 : index
    %114 = vector.load %arg11[%113, %c0_37] : memref<8x128xf32, #tpu.memory_space<vmem>>, vector<1x128xf32>
    tpu.vector_store %arg11[%113, %c0_37], %112 {strides = array<i32>} : memref<8x128xf32, #tpu.memory_space<vmem>>, vector<1x128xf32>,
    %c3_i32 = arith.constant 3 : i32
    %115 = arith.index_cast %c3_i32 : i32 to index
    %c0_38 = arith.constant 0 : index
    %116 = vector.load %arg10[%115, %c0_38] : memref<8x512xf32, #tpu.memory_space<vmem>>, vector<1x512xf32>
    %117 = arith.truncf %112 : vector<1x128xf32> to vector<1x128xbf16>
    %c0_39 = arith.constant 0 : index
    %c0_40 = arith.constant 0 : index
    %118 = vector.load %arg4[%c0_39, %c0_40] : memref<128x512xbf16, #tpu.memory_space<vmem>>, vector<128x512xbf16>
    %cst_41 = arith.constant dense<0.000000e+00> : vector<1x512xf32>
    %119 = tpu.matmul %117, %118, %cst_41 {dimension_numbers = #tpu.dot_dimension_numbers<[1], [0], [0], [1], [0, 0, 1, 1], [], []>} : vector<1x128xbf16>, vector<128x512xbf16>, vector<1x512xf32> -> vector<1x512xf32>
    %120 = arith.addf %116, %119 : vector<1x512xf32>
    %121 = vector.extract_strided_slice %120 {offsets = [0, 0], sizes = [1, 128], strides = [1, 1]} : vector<1x512xf32> to vector<1x128xf32>
    %122 = arith.negf %121 : vector<1x128xf32>
    %123 = math.exp %122 : vector<1x128xf32>
    %cst_42 = arith.constant 1.000000e+00 : f32
    %124 = vector.broadcast %cst_42 : f32 to vector<1x128xf32>
    %125 = arith.addf %124, %123 : vector<1x128xf32>
    %126 = arith.divf %124, %125 : vector<1x128xf32>
    %127 = vector.extract_strided_slice %120 {offsets = [0, 128], sizes = [1, 128], strides = [1, 1]} : vector<1x512xf32> to vector<1x128xf32>
    %128 = arith.negf %127 : vector<1x128xf32>
    %129 = math.exp %128 : vector<1x128xf32>
    %cst_43 = arith.constant 1.000000e+00 : f32
    %130 = vector.broadcast %cst_43 : f32 to vector<1x128xf32>
    %131 = arith.addf %130, %129 : vector<1x128xf32>
    %132 = arith.divf %130, %131 : vector<1x128xf32>
    %133 = vector.extract_strided_slice %120 {offsets = [0, 256], sizes = [1, 128], strides = [1, 1]} : vector<1x512xf32> to vector<1x128xf32>
    %134 = math.tanh %133 : vector<1x128xf32>
    %135 = vector.extract_strided_slice %120 {offsets = [0, 384], sizes = [1, 128], strides = [1, 1]} : vector<1x512xf32> to vector<1x128xf32>
    %136 = arith.negf %135 : vector<1x128xf32>
    %137 = math.exp %136 : vector<1x128xf32>
    %cst_44 = arith.constant 1.000000e+00 : f32
    %138 = vector.broadcast %cst_44 : f32 to vector<1x128xf32>
    %139 = arith.addf %138, %137 : vector<1x128xf32>
    %140 = arith.divf %138, %139 : vector<1x128xf32>
    %141 = arith.mulf %132, %110 : vector<1x128xf32>
    %142 = arith.mulf %126, %134 : vector<1x128xf32>
    %143 = arith.addf %141, %142 : vector<1x128xf32>
    %144 = math.tanh %143 : vector<1x128xf32>
    %145 = arith.mulf %140, %144 : vector<1x128xf32>
    %146 = arith.index_cast %c3_i32 : i32 to index
    %c0_45 = arith.constant 0 : index
    %147 = vector.load %arg11[%146, %c0_45] : memref<8x128xf32, #tpu.memory_space<vmem>>, vector<1x128xf32>
    tpu.vector_store %arg11[%146, %c0_45], %145 {strides = array<i32>} : memref<8x128xf32, #tpu.memory_space<vmem>>, vector<1x128xf32>,
    %c4_i32 = arith.constant 4 : i32
    %148 = arith.index_cast %c4_i32 : i32 to index
    %c0_46 = arith.constant 0 : index
    %149 = vector.load %arg10[%148, %c0_46] : memref<8x512xf32, #tpu.memory_space<vmem>>, vector<1x512xf32>
    %150 = arith.truncf %145 : vector<1x128xf32> to vector<1x128xbf16>
    %c0_47 = arith.constant 0 : index
    %c0_48 = arith.constant 0 : index
    %151 = vector.load %arg4[%c0_47, %c0_48] : memref<128x512xbf16, #tpu.memory_space<vmem>>, vector<128x512xbf16>
    %cst_49 = arith.constant dense<0.000000e+00> : vector<1x512xf32>
    %152 = tpu.matmul %150, %151, %cst_49 {dimension_numbers = #tpu.dot_dimension_numbers<[1], [0], [0], [1], [0, 0, 1, 1], [], []>} : vector<1x128xbf16>, vector<128x512xbf16>, vector<1x512xf32> -> vector<1x512xf32>
    %153 = arith.addf %149, %152 : vector<1x512xf32>
    %154 = vector.extract_strided_slice %153 {offsets = [0, 0], sizes = [1, 128], strides = [1, 1]} : vector<1x512xf32> to vector<1x128xf32>
    %155 = arith.negf %154 : vector<1x128xf32>
    %156 = math.exp %155 : vector<1x128xf32>
    %cst_50 = arith.constant 1.000000e+00 : f32
    %157 = vector.broadcast %cst_50 : f32 to vector<1x128xf32>
    %158 = arith.addf %157, %156 : vector<1x128xf32>
    %159 = arith.divf %157, %158 : vector<1x128xf32>
    %160 = vector.extract_strided_slice %153 {offsets = [0, 128], sizes = [1, 128], strides = [1, 1]} : vector<1x512xf32> to vector<1x128xf32>
    %161 = arith.negf %160 : vector<1x128xf32>
    %162 = math.exp %161 : vector<1x128xf32>
    %cst_51 = arith.constant 1.000000e+00 : f32
    %163 = vector.broadcast %cst_51 : f32 to vector<1x128xf32>
    %164 = arith.addf %163, %162 : vector<1x128xf32>
    %165 = arith.divf %163, %164 : vector<1x128xf32>
    %166 = vector.extract_strided_slice %153 {offsets = [0, 256], sizes = [1, 128], strides = [1, 1]} : vector<1x512xf32> to vector<1x128xf32>
    %167 = math.tanh %166 : vector<1x128xf32>
    %168 = vector.extract_strided_slice %153 {offsets = [0, 384], sizes = [1, 128], strides = [1, 1]} : vector<1x512xf32> to vector<1x128xf32>
    %169 = arith.negf %168 : vector<1x128xf32>
    %170 = math.exp %169 : vector<1x128xf32>
    %cst_52 = arith.constant 1.000000e+00 : f32
    %171 = vector.broadcast %cst_52 : f32 to vector<1x128xf32>
    %172 = arith.addf %171, %170 : vector<1x128xf32>
    %173 = arith.divf %171, %172 : vector<1x128xf32>
    %174 = arith.mulf %165, %143 : vector<1x128xf32>
    %175 = arith.mulf %159, %167 : vector<1x128xf32>
    %176 = arith.addf %174, %175 : vector<1x128xf32>
    %177 = math.tanh %176 : vector<1x128xf32>
    %178 = arith.mulf %173, %177 : vector<1x128xf32>
    %179 = arith.index_cast %c4_i32 : i32 to index
    %c0_53 = arith.constant 0 : index
    %180 = vector.load %arg11[%179, %c0_53] : memref<8x128xf32, #tpu.memory_space<vmem>>, vector<1x128xf32>
    tpu.vector_store %arg11[%179, %c0_53], %178 {strides = array<i32>} : memref<8x128xf32, #tpu.memory_space<vmem>>, vector<1x128xf32>,
    %c5_i32 = arith.constant 5 : i32
    %181 = arith.index_cast %c5_i32 : i32 to index
    %c0_54 = arith.constant 0 : index
    %182 = vector.load %arg10[%181, %c0_54] : memref<8x512xf32, #tpu.memory_space<vmem>>, vector<1x512xf32>
    %183 = arith.truncf %178 : vector<1x128xf32> to vector<1x128xbf16>
    %c0_55 = arith.constant 0 : index
    %c0_56 = arith.constant 0 : index
    %184 = vector.load %arg4[%c0_55, %c0_56] : memref<128x512xbf16, #tpu.memory_space<vmem>>, vector<128x512xbf16>
    %cst_57 = arith.constant dense<0.000000e+00> : vector<1x512xf32>
    %185 = tpu.matmul %183, %184, %cst_57 {dimension_numbers = #tpu.dot_dimension_numbers<[1], [0], [0], [1], [0, 0, 1, 1], [], []>} : vector<1x128xbf16>, vector<128x512xbf16>, vector<1x512xf32> -> vector<1x512xf32>
    %186 = arith.addf %182, %185 : vector<1x512xf32>
    %187 = vector.extract_strided_slice %186 {offsets = [0, 0], sizes = [1, 128], strides = [1, 1]} : vector<1x512xf32> to vector<1x128xf32>
    %188 = arith.negf %187 : vector<1x128xf32>
    %189 = math.exp %188 : vector<1x128xf32>
    %cst_58 = arith.constant 1.000000e+00 : f32
    %190 = vector.broadcast %cst_58 : f32 to vector<1x128xf32>
    %191 = arith.addf %190, %189 : vector<1x128xf32>
    %192 = arith.divf %190, %191 : vector<1x128xf32>
    %193 = vector.extract_strided_slice %186 {offsets = [0, 128], sizes = [1, 128], strides = [1, 1]} : vector<1x512xf32> to vector<1x128xf32>
    %194 = arith.negf %193 : vector<1x128xf32>
    %195 = math.exp %194 : vector<1x128xf32>
    %cst_59 = arith.constant 1.000000e+00 : f32
    %196 = vector.broadcast %cst_59 : f32 to vector<1x128xf32>
    %197 = arith.addf %196, %195 : vector<1x128xf32>
    %198 = arith.divf %196, %197 : vector<1x128xf32>
    %199 = vector.extract_strided_slice %186 {offsets = [0, 256], sizes = [1, 128], strides = [1, 1]} : vector<1x512xf32> to vector<1x128xf32>
    %200 = math.tanh %199 : vector<1x128xf32>
    %201 = vector.extract_strided_slice %186 {offsets = [0, 384], sizes = [1, 128], strides = [1, 1]} : vector<1x512xf32> to vector<1x128xf32>
    %202 = arith.negf %201 : vector<1x128xf32>
    %203 = math.exp %202 : vector<1x128xf32>
    %cst_60 = arith.constant 1.000000e+00 : f32
    %204 = vector.broadcast %cst_60 : f32 to vector<1x128xf32>
    %205 = arith.addf %204, %203 : vector<1x128xf32>
    %206 = arith.divf %204, %205 : vector<1x128xf32>
    %207 = arith.mulf %198, %176 : vector<1x128xf32>
    %208 = arith.mulf %192, %200 : vector<1x128xf32>
    %209 = arith.addf %207, %208 : vector<1x128xf32>
    %210 = math.tanh %209 : vector<1x128xf32>
    %211 = arith.mulf %206, %210 : vector<1x128xf32>
    %212 = arith.index_cast %c5_i32 : i32 to index
    %c0_61 = arith.constant 0 : index
    %213 = vector.load %arg11[%212, %c0_61] : memref<8x128xf32, #tpu.memory_space<vmem>>, vector<1x128xf32>
    tpu.vector_store %arg11[%212, %c0_61], %211 {strides = array<i32>} : memref<8x128xf32, #tpu.memory_space<vmem>>, vector<1x128xf32>,
    %c6_i32 = arith.constant 6 : i32
    %214 = arith.index_cast %c6_i32 : i32 to index
    %c0_62 = arith.constant 0 : index
    %215 = vector.load %arg10[%214, %c0_62] : memref<8x512xf32, #tpu.memory_space<vmem>>, vector<1x512xf32>
    %216 = arith.truncf %211 : vector<1x128xf32> to vector<1x128xbf16>
    %c0_63 = arith.constant 0 : index
    %c0_64 = arith.constant 0 : index
    %217 = vector.load %arg4[%c0_63, %c0_64] : memref<128x512xbf16, #tpu.memory_space<vmem>>, vector<128x512xbf16>
    %cst_65 = arith.constant dense<0.000000e+00> : vector<1x512xf32>
    %218 = tpu.matmul %216, %217, %cst_65 {dimension_numbers = #tpu.dot_dimension_numbers<[1], [0], [0], [1], [0, 0, 1, 1], [], []>} : vector<1x128xbf16>, vector<128x512xbf16>, vector<1x512xf32> -> vector<1x512xf32>
    %219 = arith.addf %215, %218 : vector<1x512xf32>
    %220 = vector.extract_strided_slice %219 {offsets = [0, 0], sizes = [1, 128], strides = [1, 1]} : vector<1x512xf32> to vector<1x128xf32>
    %221 = arith.negf %220 : vector<1x128xf32>
    %222 = math.exp %221 : vector<1x128xf32>
    %cst_66 = arith.constant 1.000000e+00 : f32
    %223 = vector.broadcast %cst_66 : f32 to vector<1x128xf32>
    %224 = arith.addf %223, %222 : vector<1x128xf32>
    %225 = arith.divf %223, %224 : vector<1x128xf32>
    %226 = vector.extract_strided_slice %219 {offsets = [0, 128], sizes = [1, 128], strides = [1, 1]} : vector<1x512xf32> to vector<1x128xf32>
    %227 = arith.negf %226 : vector<1x128xf32>
    %228 = math.exp %227 : vector<1x128xf32>
    %cst_67 = arith.constant 1.000000e+00 : f32
    %229 = vector.broadcast %cst_67 : f32 to vector<1x128xf32>
    %230 = arith.addf %229, %228 : vector<1x128xf32>
    %231 = arith.divf %229, %230 : vector<1x128xf32>
    %232 = vector.extract_strided_slice %219 {offsets = [0, 256], sizes = [1, 128], strides = [1, 1]} : vector<1x512xf32> to vector<1x128xf32>
    %233 = math.tanh %232 : vector<1x128xf32>
    %234 = vector.extract_strided_slice %219 {offsets = [0, 384], sizes = [1, 128], strides = [1, 1]} : vector<1x512xf32> to vector<1x128xf32>
    %235 = arith.negf %234 : vector<1x128xf32>
    %236 = math.exp %235 : vector<1x128xf32>
    %cst_68 = arith.constant 1.000000e+00 : f32
    %237 = vector.broadcast %cst_68 : f32 to vector<1x128xf32>
    %238 = arith.addf %237, %236 : vector<1x128xf32>
    %239 = arith.divf %237, %238 : vector<1x128xf32>
    %240 = arith.mulf %231, %209 : vector<1x128xf32>
    %241 = arith.mulf %225, %233 : vector<1x128xf32>
    %242 = arith.addf %240, %241 : vector<1x128xf32>
    %243 = math.tanh %242 : vector<1x128xf32>
    %244 = arith.mulf %239, %243 : vector<1x128xf32>
    %245 = arith.index_cast %c6_i32 : i32 to index
    %c0_69 = arith.constant 0 : index
    %246 = vector.load %arg11[%245, %c0_69] : memref<8x128xf32, #tpu.memory_space<vmem>>, vector<1x128xf32>
    tpu.vector_store %arg11[%245, %c0_69], %244 {strides = array<i32>} : memref<8x128xf32, #tpu.memory_space<vmem>>, vector<1x128xf32>,
    %c7_i32 = arith.constant 7 : i32
    %247 = arith.index_cast %c7_i32 : i32 to index
    %c0_70 = arith.constant 0 : index
    %248 = vector.load %arg10[%247, %c0_70] : memref<8x512xf32, #tpu.memory_space<vmem>>, vector<1x512xf32>
    %249 = arith.truncf %244 : vector<1x128xf32> to vector<1x128xbf16>
    %c0_71 = arith.constant 0 : index
    %c0_72 = arith.constant 0 : index
    %250 = vector.load %arg4[%c0_71, %c0_72] : memref<128x512xbf16, #tpu.memory_space<vmem>>, vector<128x512xbf16>
    %cst_73 = arith.constant dense<0.000000e+00> : vector<1x512xf32>
    %251 = tpu.matmul %249, %250, %cst_73 {dimension_numbers = #tpu.dot_dimension_numbers<[1], [0], [0], [1], [0, 0, 1, 1], [], []>} : vector<1x128xbf16>, vector<128x512xbf16>, vector<1x512xf32> -> vector<1x512xf32>
    %252 = arith.addf %248, %251 : vector<1x512xf32>
    %253 = vector.extract_strided_slice %252 {offsets = [0, 0], sizes = [1, 128], strides = [1, 1]} : vector<1x512xf32> to vector<1x128xf32>
    %254 = arith.negf %253 : vector<1x128xf32>
    %255 = math.exp %254 : vector<1x128xf32>
    %cst_74 = arith.constant 1.000000e+00 : f32
    %256 = vector.broadcast %cst_74 : f32 to vector<1x128xf32>
    %257 = arith.addf %256, %255 : vector<1x128xf32>
    %258 = arith.divf %256, %257 : vector<1x128xf32>
    %259 = vector.extract_strided_slice %252 {offsets = [0, 128], sizes = [1, 128], strides = [1, 1]} : vector<1x512xf32> to vector<1x128xf32>
    %260 = arith.negf %259 : vector<1x128xf32>
    %261 = math.exp %260 : vector<1x128xf32>
    %cst_75 = arith.constant 1.000000e+00 : f32
    %262 = vector.broadcast %cst_75 : f32 to vector<1x128xf32>
    %263 = arith.addf %262, %261 : vector<1x128xf32>
    %264 = arith.divf %262, %263 : vector<1x128xf32>
    %265 = vector.extract_strided_slice %252 {offsets = [0, 256], sizes = [1, 128], strides = [1, 1]} : vector<1x512xf32> to vector<1x128xf32>
    %266 = math.tanh %265 : vector<1x128xf32>
    %267 = vector.extract_strided_slice %252 {offsets = [0, 384], sizes = [1, 128], strides = [1, 1]} : vector<1x512xf32> to vector<1x128xf32>
    %268 = arith.negf %267 : vector<1x128xf32>
    %269 = math.exp %268 : vector<1x128xf32>
    %cst_76 = arith.constant 1.000000e+00 : f32
    %270 = vector.broadcast %cst_76 : f32 to vector<1x128xf32>
    %271 = arith.addf %270, %269 : vector<1x128xf32>
    %272 = arith.divf %270, %271 : vector<1x128xf32>
    %273 = arith.mulf %264, %242 : vector<1x128xf32>
    %274 = arith.mulf %258, %266 : vector<1x128xf32>
    %275 = arith.addf %273, %274 : vector<1x128xf32>
    %276 = math.tanh %275 : vector<1x128xf32>
    %277 = arith.mulf %272, %276 : vector<1x128xf32>
    %278 = arith.index_cast %c7_i32 : i32 to index
    %c0_77 = arith.constant 0 : index
    %279 = vector.load %arg11[%278, %c0_77] : memref<8x128xf32, #tpu.memory_space<vmem>>, vector<1x128xf32>
    tpu.vector_store %arg11[%278, %c0_77], %277 {strides = array<i32>} : memref<8x128xf32, #tpu.memory_space<vmem>>, vector<1x128xf32>,
    %c8_i32 = arith.constant 8 : i32
    %c0_78 = arith.constant 0 : index
    %c0_79 = arith.constant 0 : index
    %280 = vector.load %arg12[%c0_78, %c0_79] : memref<1x128xf32, #tpu.memory_space<vmem>>, vector<1x128xf32>
    tpu.vector_store %arg12[%c0_78, %c0_79], %277 {strides = array<i32>} : memref<1x128xf32, #tpu.memory_space<vmem>>, vector<1x128xf32>,
    %c0_80 = arith.constant 0 : index
    %c0_81 = arith.constant 0 : index
    %281 = vector.load %arg13[%c0_80, %c0_81] : memref<1x128xf32, #tpu.memory_space<vmem>>, vector<1x128xf32>
    tpu.vector_store %arg13[%c0_80, %c0_81], %275 {strides = array<i32>} : memref<1x128xf32, #tpu.memory_space<vmem>>, vector<1x128xf32>,
    %c0_82 = arith.constant 0 : index
    %c0_83 = arith.constant 0 : index
    %282 = vector.load %arg11[%c0_82, %c0_83] : memref<8x128xf32, #tpu.memory_space<vmem>>, vector<8x128xf32>
    %283 = arith.truncf %282 : vector<8x128xf32> to vector<8x128xbf16>
    %c0_84 = arith.constant 0 : index
    %c0_85 = arith.constant 0 : index
    %284 = vector.load %arg6[%c0_84, %c0_85] : memref<128x128xbf16, #tpu.memory_space<vmem>>, vector<128x128xbf16>
    %cst_86 = arith.constant dense<0.000000e+00> : vector<8x128xf32>
    %285 = tpu.matmul %283, %284, %cst_86 {dimension_numbers = #tpu.dot_dimension_numbers<[1], [0], [0], [1], [0, 0, 1, 1], [], []>} : vector<8x128xbf16>, vector<128x128xbf16>, vector<8x128xf32> -> vector<8x128xf32>
    %c0_87 = arith.constant 0 : index
    %c0_88 = arith.constant 0 : index
    %286 = vector.load %arg7[%c0_87, %c0_88] : memref<1x128xf32, #tpu.memory_space<vmem>>, vector<1x128xf32>
    %287 = vector.broadcast %286 : vector<1x128xf32> to vector<8x128xf32>
    %288 = arith.addf %285, %287 : vector<8x128xf32>
    %c0_89 = arith.constant 0 : index
    %c0_90 = arith.constant 0 : index
    %289 = vector.load %arg8[%c0_89, %c0_90] : memref<8x128xf32, #tpu.memory_space<vmem>>, vector<8x128xf32>
    %290 = arith.mulf %288, %289 : vector<8x128xf32>
    %c0_91 = arith.constant 0 : index
    %c0_92 = arith.constant 0 : index
    %291 = vector.load %arg14[%c0_91, %c0_92] : memref<1x128xf32, #tpu.memory_space<vmem>>, vector<1x128xf32>
    %cst_93 = arith.constant dense<0.000000e+00> : vector<128xf32>
    %292 = vector.multi_reduction <add>, %290, %cst_93 [0] : vector<8x128xf32> to vector<128xf32>
    %293 = vector.shape_cast %292 : vector<128xf32> to vector<1x128xf32>
    %294 = arith.addf %291, %293 : vector<1x128xf32>
    %c0_94 = arith.constant 0 : index
    %c0_95 = arith.constant 0 : index
    %295 = vector.load %arg14[%c0_94, %c0_95] : memref<1x128xf32, #tpu.memory_space<vmem>>, vector<1x128xf32>
    tpu.vector_store %arg14[%c0_94, %c0_95], %294 {strides = array<i32>} : memref<1x128xf32, #tpu.memory_space<vmem>>, vector<1x128xf32>,
    %c0_i32_96 = arith.constant 0 : i32
    %296 = arith.cmpi eq, %arg0, %c0_i32_96 : i32
    %297 = arith.extui %296 : i1 to i32
    %c0_i32_97 = arith.constant 0 : i32
    %298 = arith.cmpi ne, %297, %c0_i32_97 : i32
    scf.if %298 {
      %c0_98 = arith.constant 0 : index
      %c0_99 = arith.constant 0 : index
      %299 = vector.load %arg14[%c0_98, %c0_99] : memref<1x128xf32, #tpu.memory_space<vmem>>, vector<1x128xf32>
      %cst_100 = arith.constant 8.000000e+00 : f32
      %300 = vector.broadcast %cst_100 : f32 to vector<1x128xf32>
      %301 = arith.divf %299, %300 : vector<1x128xf32>
      %302 = tpu.iota {dimensions = array<i32: 1>} : vector<1x128xi32>
      %c2_i32_101 = arith.constant 2 : i32
      %303 = vector.broadcast %c2_i32_101 : i32 to vector<1x128xi32>
      %304 = arith.cmpi slt, %302, %303 : vector<1x128xi32>
      %cst_102 = arith.constant 0xFF800000 : f32
      %305 = vector.broadcast %cst_102 : f32 to vector<1x128xf32>
      %306 = arith.select %304, %301, %305 : vector<1x128xi1>, vector<1x128xf32>
      %cst_103 = arith.constant dense<0xFF800000> : vector<1xf32>
      %307 = vector.multi_reduction <maximumf>, %306, %cst_103 [1] : vector<1x128xf32> to vector<1xf32>
      %308 = vector.shape_cast %307 : vector<1xf32> to vector<1x1xf32>
      %309 = vector.broadcast %308 : vector<1x1xf32> to vector<1x128xf32>
      %310 = arith.subf %301, %309 : vector<1x128xf32>
      %311 = math.exp %310 : vector<1x128xf32>
      %cst_104 = arith.constant 0.000000e+00 : f32
      %312 = vector.broadcast %cst_104 : f32 to vector<1x128xf32>
      %313 = arith.select %304, %311, %312 : vector<1x128xi1>, vector<1x128xf32>
      %cst_105 = arith.constant dense<0.000000e+00> : vector<1xf32>
      %314 = vector.multi_reduction <add>, %313, %cst_105 [1] : vector<1x128xf32> to vector<1xf32>
      %315 = vector.shape_cast %314 : vector<1xf32> to vector<1x1xf32>
      %316 = math.log %315 : vector<1x1xf32>
      %317 = arith.addf %308, %316 : vector<1x1xf32>
      %318 = vector.broadcast %317 : vector<1x1xf32> to vector<1x128xf32>
      %319 = arith.subf %301, %318 : vector<1x128xf32>
      %c0_106 = arith.constant 0 : index
      %c0_107 = arith.constant 0 : index
      %320 = vector.load %arg9[%c0_106, %c0_107] : memref<1x128xf32, #tpu.memory_space<vmem>>, vector<1x128xf32>
      tpu.vector_store %arg9[%c0_106, %c0_107], %319 {strides = array<i32>} : memref<1x128xf32, #tpu.memory_space<vmem>>, vector<1x128xf32>,
    } else {
    }
    return
  }
  func.func @transform_0(%arg0: i32) -> i32 {
    %c0_i32 = arith.constant 0 : i32
    %c0_i32_0 = arith.constant 0 : i32
    return %c0_i32 : i32
  }
  func.func @transform_1(%arg0: i32) -> (i32, i32) {
    %c0_i32 = arith.constant 0 : i32
    %c0_i32_0 = arith.constant 0 : i32
    return %arg0, %c0_i32 : i32, i32
  }
  func.func @transform_2(%arg0: i32) -> (i32, i32) {
    %c0_i32 = arith.constant 0 : i32
    %c0_i32_0 = arith.constant 0 : i32
    %c0_i32_1 = arith.constant 0 : i32
    return %c0_i32, %c0_i32_0 : i32, i32
  }
  func.func @transform_3(%arg0: i32) -> (i32, i32) {
    %c0_i32 = arith.constant 0 : i32
    %c0_i32_0 = arith.constant 0 : i32
    %c0_i32_1 = arith.constant 0 : i32
    return %c0_i32, %c0_i32_0 : i32, i32
  }
  func.func @transform_4(%arg0: i32) -> (i32, i32) {
    %c0_i32 = arith.constant 0 : i32
    %c0_i32_0 = arith.constant 0 : i32
    %c0_i32_1 = arith.constant 0 : i32
    return %c0_i32, %c0_i32_0 : i32, i32
  }
  func.func @transform_5(%arg0: i32) -> (i32, i32) {
    %c0_i32 = arith.constant 0 : i32
    %c0_i32_0 = arith.constant 0 : i32
    %c0_i32_1 = arith.constant 0 : i32
    return %c0_i32, %c0_i32_0 : i32, i32
  }
  func.func @transform_6(%arg0: i32) -> (i32, i32) {
    %c0_i32 = arith.constant 0 : i32
    %c0_i32_0 = arith.constant 0 : i32
    %c0_i32_1 = arith.constant 0 : i32
    return %c0_i32, %c0_i32_0 : i32, i32
  }
  func.func @transform_7(%arg0: i32) -> (i32, i32) {
    %c0_i32 = arith.constant 0 : i32
    %c0_i32_0 = arith.constant 0 : i32
    return %arg0, %c0_i32 : i32, i32
  }
  func.func @transform_8(%arg0: i32) -> (i32, i32) {
    %c0_i32 = arith.constant 0 : i32
    %c0_i32_0 = arith.constant 0 : i32
    %c0_i32_1 = arith.constant 0 : i32
    return %c0_i32, %c0_i32_0 : i32, i32
  }
}

</mosaic_0001>

<bundles_post_ra>
// kernel: tpu_custom_call.1
= control target key start
LH: loop header
LB: loop body
LE: loop exit
PB: predicated region body
PF: predicated region fallthrough
CT: control target
= control target key end

     0   :  { %14 = vsyncpa [#allocation9], 0  ;;  %s4650_s0 = inlined_call_operand.<no memory space> [shape: f32[1], index: 0, kind: input, shape index: {}]   ;;  %s4651_s1 = inlined_call_operand.hbm [shape: f32[8,128], index: 1, kind: input, shape index: {}]   ;;  %s4652_s2 = inlined_call_operand.hbm [shape: bf16[128,512], index: 2, kind: input, shape index: {}]   ;;  %s4653_s3 = inlined_call_operand.hbm [shape: bf16[128,512], index: 3, kind: input, shape index: {}]   ;;  %s4654_s4 = inlined_call_operand.vmem [shape: f32[1,512], index: 4, kind: input, shape index: {}]   ;;  %s4655_s5 = inlined_call_operand.hbm [shape: bf16[128,128], index: 5, kind: input, shape index: {}]   ;;  %s4656_s6 = inlined_call_operand.vmem [shape: f32[1,128], index: 6, kind: input, shape index: {}]   ;;  %s4657_s7 = inlined_call_operand.vmem [shape: f32[8,128], index: 7, kind: input, shape index: {}]   ;;  %s4658_s8 = inlined_call_operand.hbm [shape: f32[1,128], index: 8, kind: output, shape index: {}]  }
   0x1   :  { %15 = vsyncpa [#allocation12], 0 }
   0x2   :  { %16 = vsyncpa [#allocation15], 0 }
   0x3   :  { %17 = vsyncpa [#allocation10], 0  ;;  %s4044_s27 = smov [#allocation11]   ;;  %s3926_s9 = scalar_lea.hbm %s4652_s2, 4096 }
   0x4   :  { %s35_s28 = sshll.u32 %s4044_s27, 4  ;;  %p3927_p0 = scmp.ne.s32.totalorder %s4652_s2, %s3926_s9  ;;  %s36_s28 = int_to_ptr.vmem [resolvable:$true] %s35_s28 }
   0x5   :  { %p3930_p1 = scmp.lt.u32.totalorder %s3926_s9, %s4652_s2 }
   0x7   :  { %p3932_p2 = pnand %p3930_p1, %p3927_p0 }
   0x9   :  { %3935 = shalt.err (!%p3932_p2)
}
   0xa   :  { %s3936_s14 = scalar_lea.vmem %s36_s28, 4096  ;;  %p3941_p4 = scmp.lt.s32.totalorder %s36_s28, %s36_s28 }
   0xb   :  { %p3937_p3 = scmp.ne.s32.totalorder %s36_s28, %s3936_s14  ;;  %p3942_p5 = scmp.lt.s32.totalorder %s3936_s14, %s3936_s14 }
   0xd   :  { %p3943_p6 = por %p3942_p5, %p3941_p4 }
   0xf   :  { %p3944_p7 = pnand %p3943_p6, %p3937_p3 }
  0x11   :  { %3947 = shalt.err (!%p3944_p7)
}
  0x12   :  { %s4045_s15 = smov 256   ;;  %s4046_s16 = smov 16  }
  0x13   :  { %41 = dma.hbm_to_vmem [thread:$0]  %s4652_s2, 4096, %s36_s28, [#allocation12], %s4045_s15, %s4045_s15, %s4046_s16  }
  0x14   :  { %s4047_s19 = smov [#allocation8]   ;;  %s4048_s21 = smov [#allocation13]  }
  0x15   :  { %s26_s20 = sshll.u32 %s4047_s19, 4  ;;  %s47_s22 = sshll.u32 %s4048_s21, 4  ;;  %s27_s20 = int_to_ptr.vmem [resolvable:$true] %s26_s20  ;;  %s48_s22 = int_to_ptr.vmem [resolvable:$true] %s47_s22 }
  0x16   :  { %s3948_s25 = scalar_lea.hbm %s4651_s1, 128 }
  0x17   :  { %p3949_p8 = scmp.ne.s32.totalorder %s4651_s1, %s3948_s25  ;;  %p3952_p9 = scmp.lt.u32.totalorder %s3948_s25, %s4651_s1 }
  0x19   :  { %p3954_p10 = pnand %p3952_p9, %p3949_p8 }
  0x1b   :  { %3957 = shalt.err (!%p3954_p10)
}
  0x1c   :  { %s3958_s2 = scalar_lea.vmem %s27_s20, 128  ;;  %p3963_p12 = scmp.lt.s32.totalorder %s27_s20, %s27_s20 }
  0x1d   :  { %p3959_p11 = scmp.ne.s32.totalorder %s27_s20, %s3958_s2  ;;  %p3964_p13 = scmp.lt.s32.totalorder %s3958_s2, %s3958_s2 }
  0x1f   :  { %p3965_p0 = por %p3964_p13, %p3963_p12 }
  0x21   :  { %p3966_p1 = pnand %p3965_p0, %p3959_p11 }
  0x23   :  { %3969 = shalt.err (!%p3966_p1)
}
  0x24   :  { %29 = dma.hbm_to_vmem [thread:$0]  %s4651_s1, 128, %s27_s20, [#allocation9]  }
  0x25   :  { %s3970_s12 = scalar_lea.hbm %s4653_s3, 4096 }
  0x26   :  { %p3971_p2 = scmp.ne.s32.totalorder %s4653_s3, %s3970_s12  ;;  %p3974_p3 = scmp.lt.u32.totalorder %s3970_s12, %s4653_s3 }
  0x28   :  { %p3976_p4 = pnand %p3974_p3, %p3971_p2 }
  0x2a   :  { %3979 = shalt.err (!%p3976_p4)
}
  0x2b   :  { %s3980_s19 = scalar_lea.vmem %s48_s22, 4096  ;;  %p3985_p6 = scmp.lt.s32.totalorder %s48_s22, %s48_s22 }
  0x2c   :  { %p3981_p5 = scmp.ne.s32.totalorder %s48_s22, %s3980_s19  ;;  %p3986_p7 = scmp.lt.s32.totalorder %s3980_s19, %s3980_s19 }
  0x2e   :  { %p3987_p8 = por %p3986_p7, %p3985_p6 }
  0x30   :  { %p3988_p9 = pnand %p3987_p8, %p3981_p5 }
  0x32   :  { %3991 = shalt.err (!%p3988_p9)
}
  0x33   :  { %53 = dma.hbm_to_vmem [thread:$0]  %s4653_s3, 4096, %s48_s22, [#allocation12], %s4045_s15, %s4045_s15, %s4046_s16  }
  0x34   :  { %s4049_s21 = smov [#allocation14]   ;;  %s3992_s26 = scalar_lea.hbm %s4655_s5, 1024 }
  0x35   :  { %s61_s23 = sshll.u32 %s4049_s21, 4  ;;  %p3993_p10 = scmp.ne.s32.totalorder %s4655_s5, %s3992_s26  ;;  %s62_s23 = int_to_ptr.vmem [resolvable:$true] %s61_s23 }
  0x36   :  { %p3996_p11 = scmp.lt.u32.totalorder %s3992_s26, %s4655_s5 }
  0x38   :  { %p3998_p12 = pnand %p3996_p11, %p3993_p10 }
  0x3a   :  { %4001 = shalt.err (!%p3998_p12)
}
  0x3b   :  { %s4002_s28 = scalar_lea.vmem %s62_s23, 1024  ;;  %p4007_p0 = scmp.lt.s32.totalorder %s62_s23, %s62_s23 }
  0x3c   :  { %p4003_p13 = scmp.ne.s32.totalorder %s62_s23, %s4002_s28  ;;  %p4008_p1 = scmp.lt.s32.totalorder %s4002_s28, %s4002_s28 }
  0x3e   :  { %p4009_p2 = por %p4008_p1, %p4007_p0 }
  0x40   :  { %p4010_p3 = pnand %p4009_p2, %p4003_p13 }
  0x42   :  { %4013 = shalt.err (!%p4010_p3)
}
  0x43   :  { %s4050_s3 = smov 64   ;;  %s4051_s15 = smov 4  }
  0x44   :  { %67 = dma.hbm_to_vmem [thread:$0]  %s4655_s5, 1024, %s62_s23, [#allocation15], %s4050_s3, %s4050_s3, %s4051_s15  }
  0x45   :  { %4036 = dma.done.wait [#allocation9], 128  }
  0x46   :  { %4037 = vsyncadd [#allocation9], 4294967168 }
  0x47   :  { %4038 = dma.done.wait [#allocation12], 8192  }
  0x48   :  { %4039 = vsyncadd [#allocation12], 4294959104 }
  0x49   :  { %4040 = dma.done.wait [#allocation15], 1024  }
  0x4a   :  { %4041 = vsyncadd [#allocation15], 4294966272  ;;  %v4052_v0 = vmov 0   ;;  %v4053_v1 = vmov 0.0   ;;  %v3642_v2 = vld [vmem:[#allocation11 + $0x4] ss:$16 sps:$4 sm:$0xff]   ;;  %v94_v31 = vstv %s4650_s0 }
  0x4b   :  { %343 = vmatprep.mubr.bf16.mxu0 %v4052_v0  ;;  %384 = vmatprep.mubr.bf16.mxu1 %v4052_v0  ;;  %89 = vst [vmem:[#allocation4] sm:$0x1] %v4053_v1  ;;  %90 = vst [vmem:[#allocation5] sm:$0x1] %v4053_v1  ;;  %v3644_v3 = vld [vmem:[#allocation11 + $0xc] ss:$16 sps:$4 sm:$0xff]  }
  0x4c   :  { %91 = vst [vmem:[#allocation6] sm:$0x1] %v4053_v1  ;;  %311 = vmatprep.subr.bf16.mxu0 %v3642_v2  ;;  %v3646_v4 = vld [vmem:[#allocation11] ss:$16 sps:$4 sm:$0xff]   ;;  %v3647_v5 = vld [vmem:[#allocation11 + $0x8] ss:$16 sps:$4 sm:$0xff]   ;;  %352 = vmatprep.subr.bf16.mxu1 %v3644_v3 }
  0x4d   :  { %v3648_v6 = vld [vmem:[#allocation11 + $0x24] ss:$16 sps:$4 sm:$0xff]   ;;  %312 = vmatpush1.bf16.msra.mxu0 %v3646_v4  ;;  %353 = vmatpush1.bf16.msra.mxu1 %v3647_v5  ;;  %v3650_v7 = vld [vmem:[#allocation11 + $0x2c] ss:$16 sps:$4 sm:$0xff]   ;;  %v3652_v8 = vld [vmem:[#allocation11 + $0x20] ss:$16 sps:$4 sm:$0xff]  }
  0x4e   :  { %313 = vmatprep.subr.bf16.mxu0 %v3648_v6  ;;  %v3653_v9 = vld [vmem:[#allocation11 + $0x28] ss:$16 sps:$4 sm:$0xff]   ;;  %354 = vmatprep.subr.bf16.mxu1 %v3650_v7  ;;  %v3654_v10 = vld [vmem:[#allocation11 + $0x44] ss:$16 sps:$4 sm:$0xff]   ;;  %v3656_v11 = vld [vmem:[#allocation11 + $0x4c] ss:$16 sps:$4 sm:$0xff]  }
  0x4f   :  { %v3658_v12 = vld [vmem:[#allocation11 + $0x40] ss:$16 sps:$4 sm:$0xff]   ;;  %v3659_v13 = vld [vmem:[#allocation11 + $0x48] ss:$16 sps:$4 sm:$0xff]   ;;  %v3660_v14 = vld [vmem:[#allocation11 + $0x64] ss:$16 sps:$4 sm:$0xff]  }
  0x50   :  { %v3662_v15 = vld [vmem:[#allocation11 + $0x6c] ss:$16 sps:$4 sm:$0xff]   ;;  %v3664_v16 = vld [vmem:[#allocation11 + $0x60] ss:$16 sps:$4 sm:$0xff]   ;;  %v3665_v17 = vld [vmem:[#allocation11 + $0x68] ss:$16 sps:$4 sm:$0xff]  }
  0x51   :  { %314 = vmatpush1.bf16.msra.mxu0 %v3652_v8  ;;  %355 = vmatpush1.bf16.msra.mxu1 %v3653_v9  ;;  %v3666_v18 = vld [vmem:[#allocation11 + $0x84] ss:$16 sps:$4 sm:$0xff]   ;;  %v3668_v19 = vld [vmem:[#allocation11 + $0x8c] ss:$16 sps:$4 sm:$0xff]   ;;  %v3670_v20 = vld [vmem:[#allocation11 + $0x80] ss:$16 sps:$4 sm:$0xff]  }
  0x52   :  { %315 = vmatprep.subr.bf16.mxu0 %v3654_v10  ;;  %356 = vmatprep.subr.bf16.mxu1 %v3656_v11  ;;  %v3671_v21 = vld [vmem:[#allocation11 + $0x88] ss:$16 sps:$4 sm:$0xff]   ;;  %v3672_v22 = vld [vmem:[#allocation11 + $0xa4] ss:$16 sps:$4 sm:$0xff]   ;;  %v3674_v23 = vld [vmem:[#allocation11 + $0xac] ss:$16 sps:$4 sm:$0xff]   ;;  %v131_v10 = vlaneseq }
  0x53   :  { %v3676_v24 = vld [vmem:[#allocation11 + $0xa0] ss:$16 sps:$4 sm:$0xff]   ;;  %v3677_v25 = vld [vmem:[#allocation11 + $0xa8] ss:$16 sps:$4 sm:$0xff]   ;;  %v3678_v26 = vld [vmem:[#allocation11 + $0xc4] ss:$16 sps:$4 sm:$0xff]  }
  0x54   :  { %v3680_v27 = vld [vmem:[#allocation11 + $0xcc] ss:$16 sps:$4 sm:$0xff]   ;;  %v3682_v28 = vld [vmem:[#allocation11 + $0xc0] ss:$16 sps:$4 sm:$0xff]   ;;  %v3683_v29 = vld [vmem:[#allocation11 + $0xc8] ss:$16 sps:$4 sm:$0xff]  }
  0x55   :  { %316 = vmatpush1.bf16.msra.mxu0 %v3658_v12  ;;  %357 = vmatpush1.bf16.msra.mxu1 %v3659_v13  ;;  %v93_v30 = vld [vmem:[#allocation8] sm:$0xff]  ;;  %v3684_v32 = vld [vmem:[#allocation11 + $0xe4] ss:$16 sps:$4 sm:$0xff]   ;;  %v3688_v34 = vld [vmem:[#allocation11 + $0xe0] ss:$16 sps:$4 sm:$0xff]   ;;  %v132_v11 = vshrl.u32 %v131_v10, 7 }
  0x56   :  { %317 = vmatprep.subr.bf16.mxu0 %v3660_v14  ;;  %358 = vmatprep.subr.bf16.mxu1 %v3662_v15  ;;  %v3686_v33 = vld [vmem:[#allocation11 + $0xec] ss:$16 sps:$4 sm:$0xff]   ;;  %v95_v35 = vmul.f32 %v94_v31, %v93_v30  ;;  %v3689_v36 = vld [vmem:[#allocation11 + $0xe8] ss:$16 sps:$4 sm:$0xff]   ;;  %v4164_v37 = vld [vmem:[#allocation13 + $0x4] ss:$16 sps:$4 sm:$0xff]  }
  0x57   :  { %v4166_v38 = vld [vmem:[#allocation13 + $0xc] ss:$16 sps:$4 sm:$0xff]   ;;  %v4168_v40 = vld [vmem:[#allocation13] ss:$16 sps:$4 sm:$0xff]   ;;  %v4170_v41 = vld [vmem:[#allocation13 + $0x8] ss:$16 sps:$4 sm:$0xff]  }
  0x58   :  { %v96_v39 = vpack.c.bf16 %v95_v35, %v95_v35  ;;  %v4174_v42 = vld [vmem:[#allocation13 + $0x24] ss:$16 sps:$4 sm:$0xff]   ;;  %v4176_v43 = vld [vmem:[#allocation13 + $0x2c] ss:$16 sps:$4 sm:$0xff]   ;;  %v4178_v44 = vld [vmem:[#allocation13 + $0x20] ss:$16 sps:$4 sm:$0xff]  }
  0x59   :  { %318 = vmatpush1.bf16.msra.mxu0 %v3664_v16  ;;  %359 = vmatpush1.bf16.msra.mxu1 %v3665_v17  ;;  %v4182_v45 = vld [vmem:[#allocation13 + $0x28] ss:$16 sps:$4 sm:$0xff]   ;;  %v4186_v46 = vld [vmem:[#allocation13 + $0x44] ss:$16 sps:$4 sm:$0xff]   ;;  %v4188_v47 = vld [vmem:[#allocation13 + $0x4c] ss:$16 sps:$4 sm:$0xff]  }
  0x5a   :  { %319 = vmatprep.subr.bf16.mxu0 %v3666_v18  ;;  %360 = vmatprep.subr.bf16.mxu1 %v3668_v19  ;;  %v4192_v48 = vld [vmem:[#allocation13 + $0x40] ss:$16 sps:$4 sm:$0xff]   ;;  %v4196_v49 = vld [vmem:[#allocation13 + $0x48] ss:$16 sps:$4 sm:$0xff]   ;;  %v4200_v50 = vld [vmem:[#allocation13 + $0x64] ss:$16 sps:$4 sm:$0xff]  }
  0x5b   :  { %v4202_v51 = vld [vmem:[#allocation13 + $0x6c] ss:$16 sps:$4 sm:$0xff]   ;;  %v4204_v52 = vld [vmem:[#allocation13 + $0x60] ss:$16 sps:$4 sm:$0xff]   ;;  %v4206_v53 = vld [vmem:[#allocation13 + $0x68] ss:$16 sps:$4 sm:$0xff]  }
  0x5c   :  { %v4208_v54 = vld [vmem:[#allocation13 + $0x84] ss:$16 sps:$4 sm:$0xff]   ;;  %v4210_v55 = vld [vmem:[#allocation13 + $0x8c] ss:$16 sps:$4 sm:$0xff]   ;;  %v4216_v56 = vld [vmem:[#allocation13 + $0x80] ss:$16 sps:$4 sm:$0xff]  }
  0x5d   :  { %320 = vmatpush1.bf16.msra.mxu0 %v3670_v20  ;;  %361 = vmatpush1.bf16.msra.mxu1 %v3671_v21  ;;  %v4218_v57 = vld [vmem:[#allocation13 + $0x88] ss:$16 sps:$4 sm:$0xff]   ;;  %v4220_v58 = vld [vmem:[#allocation13 + $0xa4] ss:$16 sps:$4 sm:$0xff]   ;;  %v4222_v59 = vld [vmem:[#allocation13 + $0xac] ss:$16 sps:$4 sm:$0xff]  }
  0x5e   :  { %321 = vmatprep.subr.bf16.mxu0 %v3672_v22  ;;  %362 = vmatprep.subr.bf16.mxu1 %v3674_v23  ;;  %v4228_v60 = vld [vmem:[#allocation13 + $0xa0] ss:$16 sps:$4 sm:$0xff]   ;;  %v4230_v61 = vld [vmem:[#allocation13 + $0xa8] ss:$16 sps:$4 sm:$0xff]   ;;  %v4232_v62 = vld [vmem:[#allocation13 + $0xc4] ss:$16 sps:$4 sm:$0xff]  }
  0x5f   :  { %v4234_v63 = vld [vmem:[#allocation13 + $0xcc] ss:$16 sps:$4 sm:$0xff]   ;;  %v4240_v2 = vld [vmem:[#allocation13 + $0xc0] ss:$16 sps:$4 sm:$0xff]   ;;  %v4242_v3 = vld [vmem:[#allocation13 + $0xc8] ss:$16 sps:$4 sm:$0xff]  }
  0x60   :  { %v4244_v4 = vld [vmem:[#allocation13 + $0xe4] ss:$16 sps:$4 sm:$0xff]   ;;  %v4246_v5 = vld [vmem:[#allocation13 + $0xec] ss:$16 sps:$4 sm:$0xff]   ;;  %v4254_v6 = vld [vmem:[#allocation13 + $0xe0] ss:$16 sps:$4 sm:$0xff]  }
  0x61   :  { %322 = vmatpush1.bf16.msra.mxu0 %v3676_v24  ;;  %363 = vmatpush1.bf16.msra.mxu1 %v3677_v25  ;;  %v4256_v7 = vld [vmem:[#allocation13 + $0xe8] ss:$16 sps:$4 sm:$0xff]   ;;  %v397_v8 = vld [vmem:[#allocation4] sm:$0x1]  ;;  %v133_v12 = vsub.s32 0, %v132_v11  ;;  %v141_v13 = vsub.s32 2, %v132_v11 }
  0x62   :  { %323 = vmatprep.subr.bf16.mxu0 %v3678_v26  ;;  %364 = vmatprep.subr.bf16.mxu1 %v3680_v27  ;;  %v400_v9 = vpack.c.bf16 %v397_v8, %v397_v8  ;;  %v129_v14 = vld [vmem:[%s4654_s4] sm:$0xf]  ;;  %v137_v15 = vsub.s32 1, %v132_v11  ;;  %v145_v16 = vsub.s32 3, %v132_v11  ;;  %vm4055_vm0 = vmmov 0  }
  0x63   :  { %v134_v17 = vrot.slane %v129_v14, %v133_v12  ;;  %v142_v18 = vrot.slane %v129_v14, %v141_v13  ;;  %vm3246_vm2 = vcmask 1040384  }
  0x64   :  { %v138_v19 = vrot.slane %v129_v14, %v137_v15  ;;  %v146_v20 = vrot.slane %v129_v14, %v145_v16 }
  0x65   :  { %324 = vmatpush1.bf16.msra.mxu0 %v3682_v28  ;;  %365 = vmatpush1.bf16.msra.mxu1 %v3683_v29 }
  0x66   :  { %325 = vmatprep.subr.bf16.mxu0 %v3684_v32  ;;  %366 = vmatprep.subr.bf16.mxu1 %v3686_v33  ;;  %v4054_v33 = vmov 1966171168  }
  0x69   :  { %326 = vmatpush1.bf16.msra.mxu0 %v3688_v34  ;;  %367 = vmatpush1.bf16.msra.mxu1 %v3689_v36  ;;  %v682_v34 = vunpack.c.l.s4 %v4054_v33 }
  0x6a   :  { %593 = vmatprep.subr.bf16.mxu0 %v4164_v37  ;;  %634 = vmatprep.subr.bf16.mxu1 %v4166_v38 }
  0x6b   :  { %v683_v35 = vunpack.c.0.s8 %v682_v34 }
  0x6c   :  { %344 = vmatmul.mubr.bf16.vlgmr.msra.gmra.mrb[0].mxu0 %v96_v39  ;;  %385 = vmatmul.mubr.bf16.vlgmr.msra.gmra.mrb[0].mxu1 %v96_v39 }
  0x6d   :  { %594 = vmatpush1.bf16.msra.mxu0 %v4168_v40  ;;  %635 = vmatpush1.bf16.msra.mxu1 %v4170_v41  ;;  %v4302_v36 = vsub.s32 %v683_v35, %v132_v11 }
  0x6e   :  { %595 = vmatprep.subr.bf16.mxu0 %v4174_v42  ;;  %636 = vmatprep.subr.bf16.mxu1 %v4176_v43 }
  0x6f   :  { %625 = vmatprep.mubr.bf16.mxu0 %v4052_v0  ;;  %666 = vmatprep.mubr.bf16.mxu1 %v4052_v0 }
  0x71   :  { %596 = vmatpush1.bf16.msra.mxu0 %v4178_v44  ;;  %637 = vmatpush1.bf16.msra.mxu1 %v4182_v45 }
  0x72   :  { %597 = vmatprep.subr.bf16.mxu0 %v4186_v46  ;;  %638 = vmatprep.subr.bf16.mxu1 %v4188_v47 }
  0x75   :  { %598 = vmatpush1.bf16.msra.mxu0 %v4192_v48  ;;  %639 = vmatpush1.bf16.msra.mxu1 %v4196_v49 }
  0x76   :  { %599 = vmatprep.subr.bf16.mxu0 %v4200_v50  ;;  %640 = vmatprep.subr.bf16.mxu1 %v4202_v51 }
  0x79   :  { %600 = vmatpush1.bf16.msra.mxu0 %v4204_v52  ;;  %641 = vmatpush1.bf16.msra.mxu1 %v4206_v53 }
  0x7a   :  { %601 = vmatprep.subr.bf16.mxu0 %v4208_v54  ;;  %642 = vmatprep.subr.bf16.mxu1 %v4210_v55 }
  0x7d   :  { %602 = vmatpush1.bf16.msra.mxu0 %v4216_v56  ;;  %643 = vmatpush1.bf16.msra.mxu1 %v4218_v57 }
  0x7e   :  { %603 = vmatprep.subr.bf16.mxu0 %v4220_v58  ;;  %644 = vmatprep.subr.bf16.mxu1 %v4222_v59 }
  0x81   :  { %604 = vmatpush1.bf16.msra.mxu0 %v4228_v60  ;;  %645 = vmatpush1.bf16.msra.mxu1 %v4230_v61 }
  0x82   :  { %605 = vmatprep.subr.bf16.mxu0 %v4232_v62  ;;  %646 = vmatprep.subr.bf16.mxu1 %v4234_v63 }
  0x85   :  { %606 = vmatpush1.bf16.msra.mxu0 %v4240_v2  ;;  %647 = vmatpush1.bf16.msra.mxu1 %v4242_v3 }
  0x86   :  { %607 = vmatprep.subr.bf16.mxu0 %v4244_v4  ;;  %648 = vmatprep.subr.bf16.mxu1 %v4246_v5 }
  0x89   :  { %608 = vmatpush1.bf16.msra.mxu0 %v4254_v6  ;;  %649 = vmatpush1.bf16.msra.mxu1 %v4256_v7 }
  0x8a   :  { %932 = vmatprep.subr.bf16.mxu0 %v4164_v37  ;;  %973 = vmatprep.subr.bf16.mxu1 %v4166_v38 }
  0x8c   :  { %626 = vmatmul.mubr.bf16.vlgmr.msra.gmra.mrb[4].mxu0 %v400_v9  ;;  %667 = vmatmul.mubr.bf16.vlgmr.msra.gmra.mrb[4].mxu1 %v400_v9 }
  0x8d   :  { %933 = vmatpush1.bf16.msra.mxu0 %v4168_v40  ;;  %974 = vmatpush1.bf16.msra.mxu1 %v4170_v41 }
  0x8e   :  { %934 = vmatprep.subr.bf16.mxu0 %v4174_v42  ;;  %975 = vmatprep.subr.bf16.mxu1 %v4176_v43 }
  0x8f   :  { %964 = vmatprep.mubr.bf16.mxu0 %v4052_v0  ;;  %1005 = vmatprep.mubr.bf16.mxu1 %v4052_v0 }
  0x91   :  { %935 = vmatpush1.bf16.msra.mxu0 %v4178_v44  ;;  %976 = vmatpush1.bf16.msra.mxu1 %v4182_v45 }
  0x92   :  { %936 = vmatprep.subr.bf16.mxu0 %v4186_v46  ;;  %977 = vmatprep.subr.bf16.mxu1 %v4188_v47 }
  0x95   :  { %937 = vmatpush1.bf16.msra.mxu0 %v4192_v48  ;;  %978 = vmatpush1.bf16.msra.mxu1 %v4196_v49 }
  0x96   :  { %938 = vmatprep.subr.bf16.mxu0 %v4200_v50  ;;  %979 = vmatprep.subr.bf16.mxu1 %v4202_v51 }
  0x99   :  { %939 = vmatpush1.bf16.msra.mxu0 %v4204_v52  ;;  %980 = vmatpush1.bf16.msra.mxu1 %v4206_v53 }
  0x9a   :  { %940 = vmatprep.subr.bf16.mxu0 %v4208_v54  ;;  %981 = vmatprep.subr.bf16.mxu1 %v4210_v55 }
  0x9d   :  { %941 = vmatpush1.bf16.msra.mxu0 %v4216_v56  ;;  %982 = vmatpush1.bf16.msra.mxu1 %v4218_v57 }
  0x9e   :  { %942 = vmatprep.subr.bf16.mxu0 %v4220_v58  ;;  %983 = vmatprep.subr.bf16.mxu1 %v4222_v59 }
  0xa1   :  { %943 = vmatpush1.bf16.msra.mxu0 %v4228_v60  ;;  %984 = vmatpush1.bf16.msra.mxu1 %v4230_v61 }
  0xa2   :  { %944 = vmatprep.subr.bf16.mxu0 %v4232_v62  ;;  %985 = vmatprep.subr.bf16.mxu1 %v4234_v63 }
  0xa5   :  { %945 = vmatpush1.bf16.msra.mxu0 %v4240_v2  ;;  %986 = vmatpush1.bf16.msra.mxu1 %v4242_v3 }
  0xa6   :  { %946 = vmatprep.subr.bf16.mxu0 %v4244_v4  ;;  %987 = vmatprep.subr.bf16.mxu1 %v4246_v5 }
  0xa9   :  { %947 = vmatpush1.bf16.msra.mxu0 %v4254_v6  ;;  %988 = vmatpush1.bf16.msra.mxu1 %v4256_v7 }
  0xaa   :  { %1271 = vmatprep.subr.bf16.mxu0 %v4164_v37  ;;  %1312 = vmatprep.subr.bf16.mxu1 %v4166_v38 }
 0x13f   :  { %v345_v21 = vpop.f32.mrb[0].mxu0  ;;  %v386_v22 = vpop.f32.mrb[0].mxu1 }
 0x140   :  { %v346_v23 = vadd.f32 %v345_v21, %v134_v17  ;;  %v387_v24 = vadd.f32 %v386_v22, %v142_v18  ;;  %v347_v25 = vpop.f32.mrb[1].mxu0  ;;  %v388_v26 = vpop.f32.mrb[1].mxu1 }
 0x141   :  { %v348_v27 = vadd.f32 %v347_v25, %v138_v19  ;;  %v389_v28 = vadd.f32 %v388_v26, %v146_v20  ;;  %v349_v29 = vpop.f32.mrb[2].mxu0  ;;  %v390_v30 = vpop.f32.mrb[2].mxu1 }
 0x142   :  { %393 = vst [vmem:[#allocation2] sm:$0xff] %v346_v23  ;;  %395 = vst [vmem:[#allocation2 + $0x10] sm:$0xff] %v387_v24  ;;  %v350_v31 = vpop.f32.mrb[3].mxu0  ;;  %v391_v32 = vpop.f32.mrb[3].mxu1 }
 0x143   :  { %394 = vst [vmem:[#allocation2 + $0x8] sm:$0xff] %v348_v27  ;;  %396 = vst [vmem:[#allocation2 + $0x18] sm:$0xff] %v389_v28 }
 0x14a   :  { %v399_v23 = vld [vmem:[#allocation2] ss:$8 sm:$0xf] }
 0x15f   :  { %v627_v39 = vpop.f32.mrb[4].mxu0  ;;  %v668_v8 = vpop.f32.mrb[4].mxu1 }
 0x160   :  { %v629_v9 = vpop.f32.mrb[5].mxu0  ;;  %v670_v12 = vpop.f32.mrb[5].mxu1 }
 0x161   :  { %v679_v13 = vcombine.low %v627_v39, %v629_v9  ;;  %v680_v14 = vcombine.low %v668_v8, %v670_v12  ;;  %v631_v15 = vpop.f32.mrb[6].mxu0  ;;  %v672_v16 = vpop.f32.mrb[6].mxu1  ;;  %v398_v39 = vld [vmem:[#allocation5] sm:$0x1] }
 0x162   :  { %v632_v17 = vpop.f32.mrb[7].mxu0  ;;  %v673_v18 = vpop.f32.mrb[7].mxu1 }
 0x163   :  { %v687_v19 = vrot.slane %v679_v13, %v4302_v36  ;;  %v694_v20 = vrot.slane %v680_v14, %v4302_v36 }
 0x165   :  { %v695_v21 = vcombine.low %v687_v19, %v694_v20 }
 0x167   :  { %v702_v22 = vrot.slane %v695_v21, %v4302_v36 }
 0x169   :  { %v704_v11 = vadd.f32 %v702_v22, %v399_v23 }
 0x16b   :  { %v3343_v24 = vmul.f32 -1.442695, %v704_v11  ;;  %v712_v25 = vrot.slane %v704_v11, 1  ;;  %v723_v27 = vrot.slane %v704_v11, 3  ;;  %v720_v30 = vrot.slane %v704_v11, 2 }
 0x16d   :  { %3794 = vpow2.f32 %v3343_v24  ;;  %v3344_v26 = vmul.f32 -1.442695, %v712_v25  ;;  %v3345_v28 = vmul.f32 -1.442695, %v723_v27 }
 0x16f   :  { %3796 = vpow2.f32 %v3344_v26 }
 0x170   :  { %3798 = vpow2.f32 %v3345_v28 }
 0x177   :  { %v3795_v29 = vpop.eup %3794 }
 0x178   :  { %v708_v31 = vadd.f32 1.0, %v3795_v29 }
 0x179   :  { %v3797_v32 = vpop.eup %3796 }
 0x17a   :  { %3800 = vrcp.f32 %v708_v31  ;;  %v717_v33 = vadd.f32 1.0, %v3797_v32  ;;  %v3799_v34 = vpop.eup %3798 }
 0x17b   :  { %3802 = vtanh.f32 %v720_v30  ;;  %v728_v12 = vadd.f32 1.0, %v3799_v34 }
 0x17c   :  { %3804 = vrcp.f32 %v717_v33 }
 0x17d   :  { %3806 = vrcp.f32 %v728_v12 }
 0x184   :  { %v3801_v35 = vpop.eup %3800 }
 0x185   :  { %v3803_v8 = vpop.eup %3802 }
 0x186   :  { %v3805_v9 = vpop.eup %3804  ;;  %v732_v14 = vmul.f32 %v3803_v8, %v3801_v35 }
 0x187   :  { %v731_v13 = vmul.f32 %v3805_v9, %v398_v39  ;;  %v3807_v16 = vpop.eup %3806 }
 0x189   :  { %v4307_v15 = vadd.f32 %v732_v14, %v731_v13 }
 0x18b   :  { %3808 = vtanh.f32 %v4307_v15 }
 0x195   :  { %v3809_v17 = vpop.eup %3808 }
 0x196   :  { %v735_v18 = vmul.f32 %v3809_v17, %v3807_v16 }
 0x198   :  { %736 = vst [vmem:[#allocation3] sm:$0x1] %v735_v18  ;;  %v739_v19 = vpack.c.bf16 %v735_v18, %v735_v18 }
 0x19a   :  { %965 = vmatmul.mubr.bf16.vlgmr.msra.gmra.mrb[8].mxu0 %v739_v19  ;;  %1006 = vmatmul.mubr.bf16.vlgmr.msra.gmra.mrb[8].mxu1 %v739_v19 }
 0x19b   :  { %1272 = vmatpush1.bf16.msra.mxu0 %v4168_v40  ;;  %1313 = vmatpush1.bf16.msra.mxu1 %v4170_v41 }
 0x19c   :  { %1273 = vmatprep.subr.bf16.mxu0 %v4174_v42  ;;  %1314 = vmatprep.subr.bf16.mxu1 %v4176_v43 }
 0x19d   :  { %1303 = vmatprep.mubr.bf16.mxu0 %v4052_v0  ;;  %1344 = vmatprep.mubr.bf16.mxu1 %v4052_v0 }
 0x19f   :  { %1274 = vmatpush1.bf16.msra.mxu0 %v4178_v44  ;;  %1315 = vmatpush1.bf16.msra.mxu1 %v4182_v45 }
 0x1a0   :  { %1275 = vmatprep.subr.bf16.mxu0 %v4186_v46  ;;  %1316 = vmatprep.subr.bf16.mxu1 %v4188_v47 }
 0x1a3   :  { %1276 = vmatpush1.bf16.msra.mxu0 %v4192_v48  ;;  %1317 = vmatpush1.bf16.msra.mxu1 %v4196_v49 }
 0x1a4   :  { %1277 = vmatprep.subr.bf16.mxu0 %v4200_v50  ;;  %1318 = vmatprep.subr.bf16.mxu1 %v4202_v51 }
 0x1a7   :  { %1278 = vmatpush1.bf16.msra.mxu0 %v4204_v52  ;;  %1319 = vmatpush1.bf16.msra.mxu1 %v4206_v53 }
 0x1a8   :  { %1279 = vmatprep.subr.bf16.mxu0 %v4208_v54  ;;  %1320 = vmatprep.subr.bf16.mxu1 %v4210_v55 }
 0x1ab   :  { %1280 = vmatpush1.bf16.msra.mxu0 %v4216_v56  ;;  %1321 = vmatpush1.bf16.msra.mxu1 %v4218_v57 }
 0x1ac   :  { %1281 = vmatprep.subr.bf16.mxu0 %v4220_v58  ;;  %1322 = vmatprep.subr.bf16.mxu1 %v4222_v59 }
 0x1af   :  { %1282 = vmatpush1.bf16.msra.mxu0 %v4228_v60  ;;  %1323 = vmatpush1.bf16.msra.mxu1 %v4230_v61 }
 0x1b0   :  { %1283 = vmatprep.subr.bf16.mxu0 %v4232_v62  ;;  %1324 = vmatprep.subr.bf16.mxu1 %v4234_v63 }
 0x1b3   :  { %1284 = vmatpush1.bf16.msra.mxu0 %v4240_v2  ;;  %1325 = vmatpush1.bf16.msra.mxu1 %v4242_v3 }
 0x1b4   :  { %1285 = vmatprep.subr.bf16.mxu0 %v4244_v4  ;;  %1326 = vmatprep.subr.bf16.mxu1 %v4246_v5 }
 0x1b7   :  { %1286 = vmatpush1.bf16.msra.mxu0 %v4254_v6  ;;  %1327 = vmatpush1.bf16.msra.mxu1 %v4256_v7 }
 0x1b8   :  { %1610 = vmatprep.subr.bf16.mxu0 %v4164_v37  ;;  %1651 = vmatprep.subr.bf16.mxu1 %v4166_v38  ;;  %v738_v37 = vld [vmem:[#allocation2 + $0x1] ss:$8 sm:$0xf] }
 0x26d   :  { %v966_v20 = vpop.f32.mrb[8].mxu0  ;;  %v1007_v21 = vpop.f32.mrb[8].mxu1 }
 0x26e   :  { %v968_v22 = vpop.f32.mrb[9].mxu0  ;;  %v1009_v23 = vpop.f32.mrb[9].mxu1 }
 0x26f   :  { %v1018_v11 = vcombine.low %v966_v20, %v968_v22  ;;  %v1019_v24 = vcombine.low %v1007_v21, %v1009_v23  ;;  %v970_v25 = vpop.f32.mrb[10].mxu0  ;;  %v1011_v26 = vpop.f32.mrb[10].mxu1 }
 0x270   :  { %v971_v27 = vpop.f32.mrb[11].mxu0  ;;  %v1012_v28 = vpop.f32.mrb[11].mxu1 }
 0x271   :  { %v1026_v29 = vrot.slane %v1018_v11, %v4302_v36  ;;  %v1033_v30 = vrot.slane %v1019_v24, %v4302_v36 }
 0x273   :  { %v1034_v31 = vcombine.low %v1026_v29, %v1033_v30 }
 0x275   :  { %v1041_v32 = vrot.slane %v1034_v31, %v4302_v36 }
 0x277   :  { %v1043_v33 = vadd.f32 %v1041_v32, %v738_v37 }
 0x279   :  { %v3378_v38 = vmul.f32 -1.442695, %v1043_v33  ;;  %v1051_v34 = vrot.slane %v1043_v33, 1  ;;  %v1062_v39 = vrot.slane %v1043_v33, 3  ;;  %v1059_v12 = vrot.slane %v1043_v33, 2 }
 0x27b   :  { %3810 = vpow2.f32 %v3378_v38  ;;  %v3379_v35 = vmul.f32 -1.442695, %v1051_v34  ;;  %v3380_v8 = vmul.f32 -1.442695, %v1062_v39  ;;  %v4392_v38 = vld [vmem:[#allocation13 + $0x4] ss:$16 sps:$4 sm:$0xff]  }
 0x27c   :  { %v4394_v34 = vld [vmem:[#allocation13 + $0xc] ss:$16 sps:$4 sm:$0xff]   ;;  %v4398_v39 = vld [vmem:[#allocation13 + $0x8] ss:$16 sps:$4 sm:$0xff]  }
 0x27d   :  { %3812 = vpow2.f32 %v3379_v35  ;;  %v4396_v35 = vld [vmem:[#allocation13] ss:$16 sps:$4 sm:$0xff]  }
 0x27e   :  { %3814 = vpow2.f32 %v3380_v8  ;;  %v4404_v8 = vld [vmem:[#allocation13 + $0x20] ss:$16 sps:$4 sm:$0xff]  }
 0x285   :  { %v3811_v9 = vpop.eup %3810 }
 0x286   :  { %v1047_v13 = vadd.f32 1.0, %v3811_v9  ;;  %v4406_v9 = vld [vmem:[#allocation13 + $0x24] ss:$16 sps:$4 sm:$0xff]  }
 0x287   :  { %v3813_v14 = vpop.eup %3812 }
 0x288   :  { %3816 = vrcp.f32 %v1047_v13  ;;  %v1056_v16 = vadd.f32 1.0, %v3813_v14  ;;  %v3815_v17 = vpop.eup %3814  ;;  %v4410_v13 = vld [vmem:[#allocation13 + $0x2c] ss:$16 sps:$4 sm:$0xff]   ;;  %v4412_v14 = vld [vmem:[#allocation13 + $0x44] ss:$16 sps:$4 sm:$0xff]  }
 0x289   :  { %3818 = vtanh.f32 %v1059_v12  ;;  %v1067_v21 = vadd.f32 1.0, %v3815_v17  ;;  %v4408_v12 = vld [vmem:[#allocation13 + $0x28] ss:$16 sps:$4 sm:$0xff]   ;;  %v4420_v17 = vld [vmem:[#allocation13 + $0x40] ss:$16 sps:$4 sm:$0xff]  }
 0x28a   :  { %3820 = vrcp.f32 %v1056_v16  ;;  %v4415_v16 = vld [vmem:[#allocation13 + $0x4c] ss:$16 sps:$4 sm:$0xff]  }
 0x28b   :  { %3822 = vrcp.f32 %v1067_v21  ;;  %v4432_v21 = vld [vmem:[#allocation13 + $0x60] ss:$16 sps:$4 sm:$0xff]  }
 0x292   :  { %v3817_v18 = vpop.eup %3816 }
 0x293   :  { %v3819_v19 = vpop.eup %3818 }
 0x294   :  { %v3821_v20 = vpop.eup %3820  ;;  %v1071_v23 = vmul.f32 %v3819_v19, %v3817_v18  ;;  %v4422_v18 = vld [vmem:[#allocation13 + $0x48] ss:$16 sps:$4 sm:$0xff]   ;;  %v4426_v19 = vld [vmem:[#allocation13 + $0x64] ss:$16 sps:$4 sm:$0xff]  }
 0x295   :  { %v1070_v22 = vmul.f32 %v3821_v20, %v4307_v15  ;;  %v3823_v24 = vpop.eup %3822  ;;  %v4428_v20 = vld [vmem:[#allocation13 + $0x6c] ss:$16 sps:$4 sm:$0xff]  }
 0x297   :  { %v4348_v11 = vadd.f32 %v1071_v23, %v1070_v22  ;;  %v4434_v22 = vld [vmem:[#allocation13 + $0x68] ss:$16 sps:$4 sm:$0xff]   ;;  %v4438_v23 = vld [vmem:[#allocation13 + $0x84] ss:$16 sps:$4 sm:$0xff]  }
 0x299   :  { %3824 = vtanh.f32 %v4348_v11 }
 0x2a3   :  { %v3825_v25 = vpop.eup %3824 }
 0x2a4   :  { %v1074_v26 = vmul.f32 %v3825_v25, %v3823_v24  ;;  %v4444_v24 = vld [vmem:[#allocation13 + $0x80] ss:$16 sps:$4 sm:$0xff]   ;;  %v4446_v25 = vld [vmem:[#allocation13 + $0x88] ss:$16 sps:$4 sm:$0xff]  }
 0x2a6   :  { %1075 = vst [vmem:[#allocation3 + $0x1] sm:$0x1] %v1074_v26  ;;  %v1078_v27 = vpack.c.bf16 %v1074_v26, %v1074_v26  ;;  %v4450_v26 = vld [vmem:[#allocation13 + $0xa4] ss:$16 sps:$4 sm:$0xff]  }
 0x2a8   :  { %1304 = vmatmul.mubr.bf16.vlgmr.msra.gmra.mrb[12].mxu0 %v1078_v27  ;;  %1345 = vmatmul.mubr.bf16.vlgmr.msra.gmra.mrb[12].mxu1 %v1078_v27  ;;  %v4452_v27 = vld [vmem:[#allocation13 + $0xac] ss:$16 sps:$4 sm:$0xff]  }
 0x2a9   :  { %1611 = vmatpush1.bf16.msra.mxu0 %v4168_v40  ;;  %1652 = vmatpush1.bf16.msra.mxu1 %v4170_v41 }
 0x2aa   :  { %1612 = vmatprep.subr.bf16.mxu0 %v4174_v42  ;;  %1653 = vmatprep.subr.bf16.mxu1 %v4176_v43 }
 0x2ab   :  { %1642 = vmatprep.mubr.bf16.mxu0 %v4052_v0  ;;  %1683 = vmatprep.mubr.bf16.mxu1 %v4052_v0 }
 0x2ad   :  { %1613 = vmatpush1.bf16.msra.mxu0 %v4178_v44  ;;  %1654 = vmatpush1.bf16.msra.mxu1 %v4182_v45 }
 0x2ae   :  { %1614 = vmatprep.subr.bf16.mxu0 %v4186_v46  ;;  %1655 = vmatprep.subr.bf16.mxu1 %v4188_v47 }
 0x2b1   :  { %1615 = vmatpush1.bf16.msra.mxu0 %v4192_v48  ;;  %1656 = vmatpush1.bf16.msra.mxu1 %v4196_v49 }
 0x2b2   :  { %1616 = vmatprep.subr.bf16.mxu0 %v4200_v50  ;;  %1657 = vmatprep.subr.bf16.mxu1 %v4202_v51 }
 0x2b5   :  { %1617 = vmatpush1.bf16.msra.mxu0 %v4204_v52  ;;  %1658 = vmatpush1.bf16.msra.mxu1 %v4206_v53 }
 0x2b6   :  { %1618 = vmatprep.subr.bf16.mxu0 %v4208_v54  ;;  %1659 = vmatprep.subr.bf16.mxu1 %v4210_v55  ;;  %v1077_v54 = vld [vmem:[#allocation2 + $0x2] ss:$8 sm:$0xf] }
 0x2b9   :  { %1619 = vmatpush1.bf16.msra.mxu0 %v4216_v56  ;;  %1660 = vmatpush1.bf16.msra.mxu1 %v4218_v57 }
 0x2ba   :  { %1620 = vmatprep.subr.bf16.mxu0 %v4220_v58  ;;  %1661 = vmatprep.subr.bf16.mxu1 %v4222_v59 }
 0x2bd   :  { %1621 = vmatpush1.bf16.msra.mxu0 %v4228_v60  ;;  %1662 = vmatpush1.bf16.msra.mxu1 %v4230_v61 }
 0x2be   :  { %1622 = vmatprep.subr.bf16.mxu0 %v4232_v62  ;;  %1663 = vmatprep.subr.bf16.mxu1 %v4234_v63 }
 0x2c1   :  { %1623 = vmatpush1.bf16.msra.mxu0 %v4240_v2  ;;  %1664 = vmatpush1.bf16.msra.mxu1 %v4242_v3 }
 0x2c2   :  { %1624 = vmatprep.subr.bf16.mxu0 %v4244_v4  ;;  %1665 = vmatprep.subr.bf16.mxu1 %v4246_v5 }
 0x2c5   :  { %1625 = vmatpush1.bf16.msra.mxu0 %v4254_v6  ;;  %1666 = vmatpush1.bf16.msra.mxu1 %v4256_v7 }
 0x2c6   :  { %1949 = vmatprep.subr.bf16.mxu0 %v4392_v38  ;;  %1990 = vmatprep.subr.bf16.mxu1 %v4394_v34 }
 0x37b   :  { %v1305_v40 = vpop.f32.mrb[12].mxu0  ;;  %v1346_v41 = vpop.f32.mrb[12].mxu1 }
 0x37c   :  { %v1307_v42 = vpop.f32.mrb[13].mxu0  ;;  %v1348_v43 = vpop.f32.mrb[13].mxu1 }
 0x37d   :  { %v1357_v44 = vcombine.low %v1305_v40, %v1307_v42  ;;  %v1358_v45 = vcombine.low %v1346_v41, %v1348_v43  ;;  %v1309_v46 = vpop.f32.mrb[14].mxu0  ;;  %v1350_v47 = vpop.f32.mrb[14].mxu1  ;;  %v4456_v40 = vld [vmem:[#allocation13 + $0xa0] ss:$16 sps:$4 sm:$0xff]   ;;  %v4458_v41 = vld [vmem:[#allocation13 + $0xa8] ss:$16 sps:$4 sm:$0xff]  }
 0x37e   :  { %v1310_v48 = vpop.f32.mrb[15].mxu0  ;;  %v1351_v49 = vpop.f32.mrb[15].mxu1  ;;  %v4462_v42 = vld [vmem:[#allocation13 + $0xc4] ss:$16 sps:$4 sm:$0xff]   ;;  %v4464_v43 = vld [vmem:[#allocation13 + $0xcc] ss:$16 sps:$4 sm:$0xff]  }
 0x37f   :  { %v1365_v50 = vrot.slane %v1357_v44, %v4302_v36  ;;  %v1372_v51 = vrot.slane %v1358_v45, %v4302_v36  ;;  %v4468_v44 = vld [vmem:[#allocation13 + $0xc0] ss:$16 sps:$4 sm:$0xff]   ;;  %v4470_v45 = vld [vmem:[#allocation13 + $0xc8] ss:$16 sps:$4 sm:$0xff]   ;;  %v4474_v46 = vld [vmem:[#allocation13 + $0xe4] ss:$16 sps:$4 sm:$0xff]  }
 0x380   :  { %v4476_v47 = vld [vmem:[#allocation13 + $0xec] ss:$16 sps:$4 sm:$0xff]   ;;  %v4480_v48 = vld [vmem:[#allocation13 + $0xe0] ss:$16 sps:$4 sm:$0xff]   ;;  %v4482_v49 = vld [vmem:[#allocation13 + $0xe8] ss:$16 sps:$4 sm:$0xff]  }
 0x381   :  { %v1373_v52 = vcombine.low %v1365_v50, %v1372_v51 }
 0x383   :  { %v1380_v53 = vrot.slane %v1373_v52, %v4302_v36 }
 0x385   :  { %v1382_v55 = vadd.f32 %v1380_v53, %v1077_v54 }
 0x387   :  { %v3413_v56 = vmul.f32 -1.442695, %v1382_v55  ;;  %v1390_v57 = vrot.slane %v1382_v55, 1  ;;  %v1401_v59 = vrot.slane %v1382_v55, 3  ;;  %v1398_v62 = vrot.slane %v1382_v55, 2 }
 0x389   :  { %3826 = vpow2.f32 %v3413_v56  ;;  %v3414_v58 = vmul.f32 -1.442695, %v1390_v57  ;;  %v3415_v60 = vmul.f32 -1.442695, %v1401_v59 }
 0x38b   :  { %3828 = vpow2.f32 %v3414_v58 }
 0x38c   :  { %3830 = vpow2.f32 %v3415_v60 }
 0x393   :  { %v3827_v61 = vpop.eup %3826 }
 0x394   :  { %v1386_v63 = vadd.f32 1.0, %v3827_v61 }
 0x395   :  { %v3829_v2 = vpop.eup %3828 }
 0x396   :  { %3832 = vrcp.f32 %v1386_v63  ;;  %v1395_v3 = vadd.f32 1.0, %v3829_v2  ;;  %v3831_v4 = vpop.eup %3830  ;;  %v1416_v2 = vld [vmem:[#allocation2 + $0x3] ss:$8 sm:$0xf] }
 0x397   :  { %3834 = vtanh.f32 %v1398_v62  ;;  %v1406_v15 = vadd.f32 1.0, %v3831_v4 }
 0x398   :  { %3836 = vrcp.f32 %v1395_v3 }
 0x399   :  { %3838 = vrcp.f32 %v1406_v15 }
 0x3a0   :  { %v3833_v5 = vpop.eup %3832 }
 0x3a1   :  { %v3835_v6 = vpop.eup %3834 }
 0x3a2   :  { %v3837_v7 = vpop.eup %3836  ;;  %v1410_v29 = vmul.f32 %v3835_v6, %v3833_v5 }
 0x3a3   :  { %v1409_v28 = vmul.f32 %v3837_v7, %v4348_v11  ;;  %v3839_v31 = vpop.eup %3838  ;;  %v4440_v11 = vld [vmem:[#allocation13 + $0x8c] ss:$16 sps:$4 sm:$0xff]  }
 0x3a5   :  { %v4387_v30 = vadd.f32 %v1410_v29, %v1409_v28 }
 0x3a7   :  { %3840 = vtanh.f32 %v4387_v30 }
 0x3b1   :  { %v3841_v32 = vpop.eup %3840 }
 0x3b2   :  { %v1413_v37 = vmul.f32 %v3841_v32, %v3839_v31 }
 0x3b4   :  { %1414 = vst [vmem:[#allocation3 + $0x2] sm:$0x1] %v1413_v37  ;;  %v1417_v33 = vpack.c.bf16 %v1413_v37, %v1413_v37 }
 0x3b6   :  { %1643 = vmatmul.mubr.bf16.vlgmr.msra.gmra.mrb[16].mxu0 %v1417_v33  ;;  %1684 = vmatmul.mubr.bf16.vlgmr.msra.gmra.mrb[16].mxu1 %v1417_v33 }
 0x3b7   :  { %1981 = vmatprep.mubr.bf16.mxu0 %v4052_v0  ;;  %2022 = vmatprep.mubr.bf16.mxu1 %v4052_v0 }
 0x3b8   :  { %1950 = vmatpush1.bf16.msra.mxu0 %v4396_v35  ;;  %1991 = vmatpush1.bf16.msra.mxu1 %v4398_v39 }
 0x3b9   :  { %1951 = vmatprep.subr.bf16.mxu0 %v4406_v9  ;;  %1992 = vmatprep.subr.bf16.mxu1 %v4410_v13 }
 0x3bc   :  { %1952 = vmatpush1.bf16.msra.mxu0 %v4404_v8  ;;  %1993 = vmatpush1.bf16.msra.mxu1 %v4408_v12 }
 0x3bd   :  { %1953 = vmatprep.subr.bf16.mxu0 %v4412_v14  ;;  %1994 = vmatprep.subr.bf16.mxu1 %v4415_v16 }
 0x3c0   :  { %1954 = vmatpush1.bf16.msra.mxu0 %v4420_v17  ;;  %1995 = vmatpush1.bf16.msra.mxu1 %v4422_v18 }
 0x3c1   :  { %1955 = vmatprep.subr.bf16.mxu0 %v4426_v19  ;;  %1996 = vmatprep.subr.bf16.mxu1 %v4428_v20 }
 0x3c4   :  { %1956 = vmatpush1.bf16.msra.mxu0 %v4432_v21  ;;  %1997 = vmatpush1.bf16.msra.mxu1 %v4434_v22 }
 0x3c5   :  { %1957 = vmatprep.subr.bf16.mxu0 %v4438_v23  ;;  %1998 = vmatprep.subr.bf16.mxu1 %v4440_v11 }
 0x3c8   :  { %1958 = vmatpush1.bf16.msra.mxu0 %v4444_v24  ;;  %1999 = vmatpush1.bf16.msra.mxu1 %v4446_v25 }
 0x3c9   :  { %1959 = vmatprep.subr.bf16.mxu0 %v4450_v26  ;;  %2000 = vmatprep.subr.bf16.mxu1 %v4452_v27 }
 0x3cc   :  { %1960 = vmatpush1.bf16.msra.mxu0 %v4456_v40  ;;  %2001 = vmatpush1.bf16.msra.mxu1 %v4458_v41 }
 0x3cd   :  { %1961 = vmatprep.subr.bf16.mxu0 %v4462_v42  ;;  %2002 = vmatprep.subr.bf16.mxu1 %v4464_v43 }
 0x3d0   :  { %1962 = vmatpush1.bf16.msra.mxu0 %v4468_v44  ;;  %2003 = vmatpush1.bf16.msra.mxu1 %v4470_v45 }
 0x3d1   :  { %1963 = vmatprep.subr.bf16.mxu0 %v4474_v46  ;;  %2004 = vmatprep.subr.bf16.mxu1 %v4476_v47 }
 0x3d4   :  { %1964 = vmatpush1.bf16.msra.mxu0 %v4480_v48  ;;  %2005 = vmatpush1.bf16.msra.mxu1 %v4482_v49 }
 0x3d5   :  { %2288 = vmatprep.subr.bf16.mxu0 %v4392_v38  ;;  %2329 = vmatprep.subr.bf16.mxu1 %v4394_v34 }
 0x489   :  { %v1644_v50 = vpop.f32.mrb[16].mxu0  ;;  %v1685_v51 = vpop.f32.mrb[16].mxu1 }
 0x48a   :  { %v1646_v52 = vpop.f32.mrb[17].mxu0  ;;  %v1687_v53 = vpop.f32.mrb[17].mxu1 }
 0x48b   :  { %v1696_v54 = vcombine.low %v1644_v50, %v1646_v52  ;;  %v1697_v55 = vcombine.low %v1685_v51, %v1687_v53  ;;  %v1648_v56 = vpop.f32.mrb[18].mxu0  ;;  %v1689_v57 = vpop.f32.mrb[18].mxu1 }
 0x48c   :  { %v1649_v58 = vpop.f32.mrb[19].mxu0  ;;  %v1690_v59 = vpop.f32.mrb[19].mxu1 }
 0x48d   :  { %v1704_v60 = vrot.slane %v1696_v54, %v4302_v36  ;;  %v1711_v61 = vrot.slane %v1697_v55, %v4302_v36 }
 0x48f   :  { %v1712_v62 = vcombine.low %v1704_v60, %v1711_v61 }
 0x491   :  { %v1719_v63 = vrot.slane %v1712_v62, %v4302_v36 }
 0x493   :  { %v1721_v3 = vadd.f32 %v1719_v63, %v1416_v2 }
 0x495   :  { %v3448_v4 = vmul.f32 -1.442695, %v1721_v3  ;;  %v1729_v5 = vrot.slane %v1721_v3, 1  ;;  %v1740_v7 = vrot.slane %v1721_v3, 3  ;;  %v1737_v29 = vrot.slane %v1721_v3, 2 }
 0x497   :  { %3842 = vpow2.f32 %v3448_v4  ;;  %v3449_v6 = vmul.f32 -1.442695, %v1729_v5  ;;  %v3450_v15 = vmul.f32 -1.442695, %v1740_v7 }
 0x499   :  { %3844 = vpow2.f32 %v3449_v6 }
 0x49a   :  { %3846 = vpow2.f32 %v3450_v15 }
 0x4a1   :  { %v3843_v28 = vpop.eup %3842 }
 0x4a2   :  { %v1725_v31 = vadd.f32 1.0, %v3843_v28 }
 0x4a3   :  { %v3845_v32 = vpop.eup %3844 }
 0x4a4   :  { %3848 = vrcp.f32 %v1725_v31  ;;  %v1734_v37 = vadd.f32 1.0, %v3845_v32  ;;  %v3847_v33 = vpop.eup %3846  ;;  %v1755_v32 = vld [vmem:[#allocation2 + $0x4] ss:$8 sm:$0xf] }
 0x4a5   :  { %3850 = vtanh.f32 %v1737_v29  ;;  %v1745_v53 = vadd.f32 1.0, %v3847_v33 }
 0x4a6   :  { %3852 = vrcp.f32 %v1734_v37 }
 0x4a7   :  { %3854 = vrcp.f32 %v1745_v53 }
 0x4ae   :  { %v3849_v50 = vpop.eup %3848 }
 0x4af   :  { %v3851_v51 = vpop.eup %3850 }
 0x4b0   :  { %v3853_v52 = vpop.eup %3852  ;;  %v1749_v55 = vmul.f32 %v3851_v51, %v3849_v50 }
 0x4b1   :  { %v1748_v54 = vmul.f32 %v3853_v52, %v4387_v30  ;;  %v3855_v57 = vpop.eup %3854 }
 0x4b3   :  { %v4494_v56 = vadd.f32 %v1749_v55, %v1748_v54 }
 0x4b5   :  { %3856 = vtanh.f32 %v4494_v56 }
 0x4bf   :  { %v3857_v58 = vpop.eup %3856 }
 0x4c0   :  { %v1752_v59 = vmul.f32 %v3857_v58, %v3855_v57 }
 0x4c2   :  { %1753 = vst [vmem:[#allocation3 + $0x3] sm:$0x1] %v1752_v59  ;;  %v1756_v60 = vpack.c.bf16 %v1752_v59, %v1752_v59 }
 0x4c4   :  { %1982 = vmatmul.mubr.bf16.vlgmr.msra.gmra.mrb[20].mxu0 %v1756_v60  ;;  %2023 = vmatmul.mubr.bf16.vlgmr.msra.gmra.mrb[20].mxu1 %v1756_v60 }
 0x4c5   :  { %2289 = vmatpush1.bf16.msra.mxu0 %v4396_v35  ;;  %2330 = vmatpush1.bf16.msra.mxu1 %v4398_v39 }
 0x4c6   :  { %2290 = vmatprep.subr.bf16.mxu0 %v4406_v9  ;;  %2331 = vmatprep.subr.bf16.mxu1 %v4410_v13 }
 0x4c7   :  { %2320 = vmatprep.mubr.bf16.mxu0 %v4052_v0  ;;  %2361 = vmatprep.mubr.bf16.mxu1 %v4052_v0 }
 0x4c9   :  { %2291 = vmatpush1.bf16.msra.mxu0 %v4404_v8  ;;  %2332 = vmatpush1.bf16.msra.mxu1 %v4408_v12 }
 0x4ca   :  { %2292 = vmatprep.subr.bf16.mxu0 %v4412_v14  ;;  %2333 = vmatprep.subr.bf16.mxu1 %v4415_v16 }
 0x4cd   :  { %2293 = vmatpush1.bf16.msra.mxu0 %v4420_v17  ;;  %2334 = vmatpush1.bf16.msra.mxu1 %v4422_v18 }
 0x4ce   :  { %2294 = vmatprep.subr.bf16.mxu0 %v4426_v19  ;;  %2335 = vmatprep.subr.bf16.mxu1 %v4428_v20 }
 0x4d1   :  { %2295 = vmatpush1.bf16.msra.mxu0 %v4432_v21  ;;  %2336 = vmatpush1.bf16.msra.mxu1 %v4434_v22 }
 0x4d2   :  { %2296 = vmatprep.subr.bf16.mxu0 %v4438_v23  ;;  %2337 = vmatprep.subr.bf16.mxu1 %v4440_v11 }
 0x4d5   :  { %2297 = vmatpush1.bf16.msra.mxu0 %v4444_v24  ;;  %2338 = vmatpush1.bf16.msra.mxu1 %v4446_v25 }
 0x4d6   :  { %2298 = vmatprep.subr.bf16.mxu0 %v4450_v26  ;;  %2339 = vmatprep.subr.bf16.mxu1 %v4452_v27 }
 0x4d9   :  { %2299 = vmatpush1.bf16.msra.mxu0 %v4456_v40  ;;  %2340 = vmatpush1.bf16.msra.mxu1 %v4458_v41 }
 0x4da   :  { %2300 = vmatprep.subr.bf16.mxu0 %v4462_v42  ;;  %2341 = vmatprep.subr.bf16.mxu1 %v4464_v43 }
 0x4dd   :  { %2301 = vmatpush1.bf16.msra.mxu0 %v4468_v44  ;;  %2342 = vmatpush1.bf16.msra.mxu1 %v4470_v45 }
 0x4de   :  { %2302 = vmatprep.subr.bf16.mxu0 %v4474_v46  ;;  %2343 = vmatprep.subr.bf16.mxu1 %v4476_v47 }
 0x4e1   :  { %2303 = vmatpush1.bf16.msra.mxu0 %v4480_v48  ;;  %2344 = vmatpush1.bf16.msra.mxu1 %v4482_v49 }
 0x4e2   :  { %2627 = vmatprep.subr.bf16.mxu0 %v4392_v38  ;;  %2668 = vmatprep.subr.bf16.mxu1 %v4394_v34 }
 0x597   :  { %v1983_v30 = vpop.f32.mrb[20].mxu0  ;;  %v2024_v61 = vpop.f32.mrb[20].mxu1 }
 0x598   :  { %v1985_v62 = vpop.f32.mrb[21].mxu0  ;;  %v2026_v63 = vpop.f32.mrb[21].mxu1 }
 0x599   :  { %v2035_v2 = vcombine.low %v1983_v30, %v1985_v62  ;;  %v2036_v3 = vcombine.low %v2024_v61, %v2026_v63  ;;  %v1987_v4 = vpop.f32.mrb[22].mxu0  ;;  %v2028_v5 = vpop.f32.mrb[22].mxu1 }
 0x59a   :  { %v1988_v6 = vpop.f32.mrb[23].mxu0  ;;  %v2029_v7 = vpop.f32.mrb[23].mxu1 }
 0x59b   :  { %v2043_v15 = vrot.slane %v2035_v2, %v4302_v36  ;;  %v2050_v28 = vrot.slane %v2036_v3, %v4302_v36 }
 0x59d   :  { %v2051_v29 = vcombine.low %v2043_v15, %v2050_v28 }
 0x59f   :  { %v2058_v31 = vrot.slane %v2051_v29, %v4302_v36 }
 0x5a1   :  { %v2060_v37 = vadd.f32 %v2058_v31, %v1755_v32 }
 0x5a3   :  { %v3483_v33 = vmul.f32 -1.442695, %v2060_v37  ;;  %v2068_v50 = vrot.slane %v2060_v37, 1  ;;  %v2079_v52 = vrot.slane %v2060_v37, 3  ;;  %v2076_v55 = vrot.slane %v2060_v37, 2 }
 0x5a5   :  { %3858 = vpow2.f32 %v3483_v33  ;;  %v3484_v51 = vmul.f32 -1.442695, %v2068_v50  ;;  %v3485_v53 = vmul.f32 -1.442695, %v2079_v52 }
 0x5a7   :  { %3860 = vpow2.f32 %v3484_v51 }
 0x5a8   :  { %3862 = vpow2.f32 %v3485_v53 }
 0x5af   :  { %v3859_v54 = vpop.eup %3858 }
 0x5b0   :  { %v2064_v57 = vadd.f32 1.0, %v3859_v54 }
 0x5b1   :  { %v3861_v58 = vpop.eup %3860 }
 0x5b2   :  { %3864 = vrcp.f32 %v2064_v57  ;;  %v2073_v59 = vadd.f32 1.0, %v3861_v58  ;;  %v3863_v60 = vpop.eup %3862 }
 0x5b3   :  { %3866 = vtanh.f32 %v2076_v55  ;;  %v2084_v63 = vadd.f32 1.0, %v3863_v60 }
 0x5b4   :  { %3868 = vrcp.f32 %v2073_v59 }
 0x5b5   :  { %3870 = vrcp.f32 %v2084_v63 }
 0x5bc   :  { %v3865_v30 = vpop.eup %3864 }
 0x5bd   :  { %v3867_v61 = vpop.eup %3866 }
 0x5be   :  { %v3869_v62 = vpop.eup %3868  ;;  %v2088_v3 = vmul.f32 %v3867_v61, %v3865_v30 }
 0x5bf   :  { %v2087_v2 = vmul.f32 %v3869_v62, %v4494_v56  ;;  %v3871_v5 = vpop.eup %3870 }
 0x5c1   :  { %v4535_v4 = vadd.f32 %v2088_v3, %v2087_v2 }
 0x5c3   :  { %3872 = vtanh.f32 %v4535_v4 }
 0x5cd   :  { %v3873_v6 = vpop.eup %3872 }
 0x5ce   :  { %v2091_v7 = vmul.f32 %v3873_v6, %v3871_v5 }
 0x5d0   :  { %2092 = vst [vmem:[#allocation3 + $0x4] sm:$0x1] %v2091_v7  ;;  %v2095_v15 = vpack.c.bf16 %v2091_v7, %v2091_v7 }
 0x5d2   :  { %2321 = vmatmul.mubr.bf16.vlgmr.msra.gmra.mrb[24].mxu0 %v2095_v15  ;;  %2362 = vmatmul.mubr.bf16.vlgmr.msra.gmra.mrb[24].mxu1 %v2095_v15 }
 0x5d3   :  { %2628 = vmatpush1.bf16.msra.mxu0 %v4396_v35  ;;  %2669 = vmatpush1.bf16.msra.mxu1 %v4398_v39 }
 0x5d4   :  { %2629 = vmatprep.subr.bf16.mxu0 %v4406_v9  ;;  %2670 = vmatprep.subr.bf16.mxu1 %v4410_v13 }
 0x5d5   :  { %2659 = vmatprep.mubr.bf16.mxu0 %v4052_v0  ;;  %2700 = vmatprep.mubr.bf16.mxu1 %v4052_v0 }
 0x5d7   :  { %2630 = vmatpush1.bf16.msra.mxu0 %v4404_v8  ;;  %2671 = vmatpush1.bf16.msra.mxu1 %v4408_v12 }
 0x5d8   :  { %2631 = vmatprep.subr.bf16.mxu0 %v4412_v14  ;;  %2672 = vmatprep.subr.bf16.mxu1 %v4415_v16 }
 0x5db   :  { %2632 = vmatpush1.bf16.msra.mxu0 %v4420_v17  ;;  %2673 = vmatpush1.bf16.msra.mxu1 %v4422_v18 }
 0x5dc   :  { %2633 = vmatprep.subr.bf16.mxu0 %v4426_v19  ;;  %2674 = vmatprep.subr.bf16.mxu1 %v4428_v20 }
 0x5df   :  { %2634 = vmatpush1.bf16.msra.mxu0 %v4432_v21  ;;  %2675 = vmatpush1.bf16.msra.mxu1 %v4434_v22 }
 0x5e0   :  { %2635 = vmatprep.subr.bf16.mxu0 %v4438_v23  ;;  %2676 = vmatprep.subr.bf16.mxu1 %v4440_v11 }
 0x5e3   :  { %2636 = vmatpush1.bf16.msra.mxu0 %v4444_v24  ;;  %2677 = vmatpush1.bf16.msra.mxu1 %v4446_v25 }
 0x5e4   :  { %2637 = vmatprep.subr.bf16.mxu0 %v4450_v26  ;;  %2678 = vmatprep.subr.bf16.mxu1 %v4452_v27 }
 0x5e7   :  { %2638 = vmatpush1.bf16.msra.mxu0 %v4456_v40  ;;  %2679 = vmatpush1.bf16.msra.mxu1 %v4458_v41 }
 0x5e8   :  { %2639 = vmatprep.subr.bf16.mxu0 %v4462_v42  ;;  %2680 = vmatprep.subr.bf16.mxu1 %v4464_v43 }
 0x5eb   :  { %2640 = vmatpush1.bf16.msra.mxu0 %v4468_v44  ;;  %2681 = vmatpush1.bf16.msra.mxu1 %v4470_v45 }
 0x5ec   :  { %2641 = vmatprep.subr.bf16.mxu0 %v4474_v46  ;;  %2682 = vmatprep.subr.bf16.mxu1 %v4476_v47 }
 0x5ef   :  { %2642 = vmatpush1.bf16.msra.mxu0 %v4480_v48  ;;  %2683 = vmatpush1.bf16.msra.mxu1 %v4482_v49 }
 0x5f0   :  { %2966 = vmatprep.subr.bf16.mxu0 %v4392_v38  ;;  %3007 = vmatprep.subr.bf16.mxu1 %v4394_v34  ;;  %v2094_v38 = vld [vmem:[#allocation2 + $0x5] ss:$8 sm:$0xf] }
 0x6a5   :  { %v2322_v56 = vpop.f32.mrb[24].mxu0  ;;  %v2363_v28 = vpop.f32.mrb[24].mxu1 }
 0x6a6   :  { %v2324_v29 = vpop.f32.mrb[25].mxu0  ;;  %v2365_v31 = vpop.f32.mrb[25].mxu1 }
 0x6a7   :  { %v2374_v32 = vcombine.low %v2322_v56, %v2324_v29  ;;  %v2375_v37 = vcombine.low %v2363_v28, %v2365_v31  ;;  %v2326_v33 = vpop.f32.mrb[26].mxu0  ;;  %v2367_v50 = vpop.f32.mrb[26].mxu1 }
 0x6a8   :  { %v2327_v51 = vpop.f32.mrb[27].mxu0  ;;  %v2368_v52 = vpop.f32.mrb[27].mxu1 }
 0x6a9   :  { %v2382_v53 = vrot.slane %v2374_v32, %v4302_v36  ;;  %v2389_v54 = vrot.slane %v2375_v37, %v4302_v36 }
 0x6ab   :  { %v2390_v55 = vcombine.low %v2382_v53, %v2389_v54 }
 0x6ad   :  { %v2397_v57 = vrot.slane %v2390_v55, %v4302_v36 }
 0x6af   :  { %v2399_v58 = vadd.f32 %v2397_v57, %v2094_v38 }
 0x6b1   :  { %v3518_v34 = vmul.f32 -1.442695, %v2399_v58  ;;  %v2407_v59 = vrot.slane %v2399_v58, 1  ;;  %v2418_v30 = vrot.slane %v2399_v58, 3  ;;  %v2415_v63 = vrot.slane %v2399_v58, 2  ;;  %v3786_v58 = vld [vmem:[#allocation14] sm:$0xff]  }
 0x6b3   :  { %3874 = vpow2.f32 %v3518_v34  ;;  %v3519_v60 = vmul.f32 -1.442695, %v2407_v59  ;;  %v3520_v61 = vmul.f32 -1.442695, %v2418_v30  ;;  %v3787_v34 = vld [vmem:[#allocation14 + $0x8] sm:$0xff]   ;;  %v3788_v59 = vld [vmem:[#allocation14 + $0x10] sm:$0xff]  }
 0x6b4   :  { %v3790_v30 = vld [vmem:[#allocation14 + $0x20] sm:$0xff]  }
 0x6b5   :  { %3876 = vpow2.f32 %v3519_v60  ;;  %v3789_v60 = vld [vmem:[#allocation14 + $0x18] sm:$0xff]  }
 0x6b6   :  { %3878 = vpow2.f32 %v3520_v61  ;;  %v3791_v61 = vld [vmem:[#allocation14 + $0x28] sm:$0xff]  }
 0x6bd   :  { %v3875_v62 = vpop.eup %3874 }
 0x6be   :  { %v2403_v2 = vadd.f32 1.0, %v3875_v62  ;;  %v3792_v62 = vld [vmem:[#allocation14 + $0x30] sm:$0xff]  }
 0x6bf   :  { %v3877_v3 = vpop.eup %3876 }
 0x6c0   :  { %3880 = vrcp.f32 %v2403_v2  ;;  %v2412_v5 = vadd.f32 1.0, %v3877_v3  ;;  %v3879_v6 = vpop.eup %3878 }
 0x6c1   :  { %3882 = vtanh.f32 %v2415_v63  ;;  %v2423_v28 = vadd.f32 1.0, %v3879_v6  ;;  %v3793_v63 = vld [vmem:[#allocation14 + $0x38] sm:$0xff]  }
 0x6c2   :  { %3884 = vrcp.f32 %v2412_v5 }
 0x6c3   :  { %3886 = vrcp.f32 %v2423_v28 }
 0x6ca   :  { %v3881_v7 = vpop.eup %3880 }
 0x6cb   :  { %v3883_v15 = vpop.eup %3882 }
 0x6cc   :  { %v3885_v56 = vpop.eup %3884  ;;  %v2427_v31 = vmul.f32 %v3883_v15, %v3881_v7 }
 0x6cd   :  { %v2426_v29 = vmul.f32 %v3885_v56, %v4535_v4  ;;  %v3887_v37 = vpop.eup %3886 }
 0x6cf   :  { %v4576_v32 = vadd.f32 %v2427_v31, %v2426_v29 }
 0x6d1   :  { %3888 = vtanh.f32 %v4576_v32 }
 0x6db   :  { %v3889_v33 = vpop.eup %3888 }
 0x6dc   :  { %v2430_v50 = vmul.f32 %v3889_v33, %v3887_v37 }
 0x6de   :  { %2431 = vst [vmem:[#allocation3 + $0x5] sm:$0x1] %v2430_v50  ;;  %v2434_v51 = vpack.c.bf16 %v2430_v50, %v2430_v50 }
 0x6e0   :  { %2660 = vmatmul.mubr.bf16.vlgmr.msra.gmra.mrb[28].mxu0 %v2434_v51  ;;  %2701 = vmatmul.mubr.bf16.vlgmr.msra.gmra.mrb[28].mxu1 %v2434_v51  ;;  %v2772_v51 = vld [vmem:[#allocation2 + $0x7] ss:$8 sm:$0xf] }
 0x6e1   :  { %2967 = vmatpush1.bf16.msra.mxu0 %v4396_v35  ;;  %3008 = vmatpush1.bf16.msra.mxu1 %v4398_v39 }
 0x6e2   :  { %2968 = vmatprep.subr.bf16.mxu0 %v4406_v9  ;;  %3009 = vmatprep.subr.bf16.mxu1 %v4410_v13 }
 0x6e3   :  { %2998 = vmatprep.mubr.bf16.mxu0 %v4052_v0  ;;  %3039 = vmatprep.mubr.bf16.mxu1 %v4052_v0 }
 0x6e5   :  { %2969 = vmatpush1.bf16.msra.mxu0 %v4404_v8  ;;  %3010 = vmatpush1.bf16.msra.mxu1 %v4408_v12 }
 0x6e6   :  { %2970 = vmatprep.subr.bf16.mxu0 %v4412_v14  ;;  %3011 = vmatprep.subr.bf16.mxu1 %v4415_v16 }
 0x6e9   :  { %2971 = vmatpush1.bf16.msra.mxu0 %v4420_v17  ;;  %3012 = vmatpush1.bf16.msra.mxu1 %v4422_v18 }
 0x6ea   :  { %2972 = vmatprep.subr.bf16.mxu0 %v4426_v19  ;;  %3013 = vmatprep.subr.bf16.mxu1 %v4428_v20 }
 0x6ed   :  { %2973 = vmatpush1.bf16.msra.mxu0 %v4432_v21  ;;  %3014 = vmatpush1.bf16.msra.mxu1 %v4434_v22  ;;  %v2433_v22 = vld [vmem:[#allocation2 + $0x6] ss:$8 sm:$0xf] }
 0x6ee   :  { %2974 = vmatprep.subr.bf16.mxu0 %v4438_v23  ;;  %3015 = vmatprep.subr.bf16.mxu1 %v4440_v11 }
 0x6f1   :  { %2975 = vmatpush1.bf16.msra.mxu0 %v4444_v24  ;;  %3016 = vmatpush1.bf16.msra.mxu1 %v4446_v25 }
 0x6f2   :  { %2976 = vmatprep.subr.bf16.mxu0 %v4450_v26  ;;  %3017 = vmatprep.subr.bf16.mxu1 %v4452_v27 }
 0x6f5   :  { %2977 = vmatpush1.bf16.msra.mxu0 %v4456_v40  ;;  %3018 = vmatpush1.bf16.msra.mxu1 %v4458_v41 }
 0x6f6   :  { %2978 = vmatprep.subr.bf16.mxu0 %v4462_v42  ;;  %3019 = vmatprep.subr.bf16.mxu1 %v4464_v43 }
 0x6f9   :  { %2979 = vmatpush1.bf16.msra.mxu0 %v4468_v44  ;;  %3020 = vmatpush1.bf16.msra.mxu1 %v4470_v45 }
 0x6fa   :  { %2980 = vmatprep.subr.bf16.mxu0 %v4474_v46  ;;  %3021 = vmatprep.subr.bf16.mxu1 %v4476_v47 }
 0x6fd   :  { %2981 = vmatpush1.bf16.msra.mxu0 %v4480_v48  ;;  %3022 = vmatpush1.bf16.msra.mxu1 %v4482_v49 }
 0x6fe   :  { %3609 = vmatprep.subr.bf16.mxu0 %v4053_v1 }
 0x7b3   :  { %v2661_v0 = vpop.f32.mrb[28].mxu0  ;;  %v2702_v35 = vpop.f32.mrb[28].mxu1 }
 0x7b4   :  { %v2663_v39 = vpop.f32.mrb[29].mxu0  ;;  %v2704_v8 = vpop.f32.mrb[29].mxu1 }
 0x7b5   :  { %v2713_v9 = vcombine.low %v2661_v0, %v2663_v39  ;;  %v2714_v12 = vcombine.low %v2702_v35, %v2704_v8  ;;  %v2665_v13 = vpop.f32.mrb[30].mxu0  ;;  %v2706_v14 = vpop.f32.mrb[30].mxu1 }
 0x7b6   :  { %v2666_v16 = vpop.f32.mrb[31].mxu0  ;;  %v2707_v17 = vpop.f32.mrb[31].mxu1 }
 0x7b7   :  { %v2721_v18 = vrot.slane %v2713_v9, %v4302_v36  ;;  %v2728_v19 = vrot.slane %v2714_v12, %v4302_v36 }
 0x7b9   :  { %v2729_v20 = vcombine.low %v2721_v18, %v2728_v19 }
 0x7bb   :  { %v2736_v21 = vrot.slane %v2729_v20, %v4302_v36 }
 0x7bd   :  { %v2738_v23 = vadd.f32 %v2736_v21, %v2433_v22 }
 0x7bf   :  { %v3553_v11 = vmul.f32 -1.442695, %v2738_v23  ;;  %v2746_v24 = vrot.slane %v2738_v23, 1  ;;  %v2757_v26 = vrot.slane %v2738_v23, 3  ;;  %v2754_v41 = vrot.slane %v2738_v23, 2 }
 0x7c1   :  { %3890 = vpow2.f32 %v3553_v11  ;;  %v3554_v25 = vmul.f32 -1.442695, %v2746_v24  ;;  %v3555_v27 = vmul.f32 -1.442695, %v2757_v26 }
 0x7c3   :  { %3892 = vpow2.f32 %v3554_v25 }
 0x7c4   :  { %3894 = vpow2.f32 %v3555_v27 }
 0x7cb   :  { %v3891_v40 = vpop.eup %3890 }
 0x7cc   :  { %v2742_v42 = vadd.f32 1.0, %v3891_v40 }
 0x7cd   :  { %v3893_v43 = vpop.eup %3892 }
 0x7ce   :  { %3896 = vrcp.f32 %v2742_v42  ;;  %v2751_v44 = vadd.f32 1.0, %v3893_v43  ;;  %v3895_v45 = vpop.eup %3894  ;;  %v3225_v43 = vld [vmem:[%s4657_s7] sm:$0xff] }
 0x7cf   :  { %3898 = vtanh.f32 %v2754_v41  ;;  %v2762_v49 = vadd.f32 1.0, %v3895_v45  ;;  %v3591_v41 = vld [vmem:[%s4656_s6] ss:$0 sm:$0xff]  ;;  %s4056_s6 = smov [#allocation16]  }
 0x7d0   :  { %3900 = vrcp.f32 %v2751_v44  ;;  %s3268_s7 = sshll.u32 %s4056_s6, 4  ;;  %s3269_s7 = int_to_ptr.vmem [resolvable:$true] %s3268_s7 }
 0x7d1   :  { %3902 = vrcp.f32 %v2762_v49  ;;  %s4014_s14 = scalar_lea.vmem %s3269_s7, 16  ;;  %s4018_s17 = scalar_lea.vmem %s3269_s7, 32 }
 0x7d2   :  { %p4015_p4 = scmp.ne.s32.totalorder %s3269_s7, %s4014_s14  ;;  %p4019_p5 = scmp.lt.s32.totalorder %s3269_s7, %s3269_s7 }
 0x7d3   :  { %p4020_p6 = scmp.lt.s32.totalorder %s4018_s17, %s4014_s14 }
 0x7d5   :  { %p4021_p7 = por %p4020_p6, %p4019_p5 }
 0x7d7   :  { %p4022_p8 = pnand %p4021_p7, %p4015_p4 }
 0x7d8   :  { %v3897_v46 = vpop.eup %3896 }
 0x7d9   :  { %v3899_v47 = vpop.eup %3898 }
 0x7da   :  { %v3901_v48 = vpop.eup %3900  ;;  %v2766_v52 = vmul.f32 %v3899_v47, %v3897_v46 }
 0x7db   :  { %v2765_v4 = vmul.f32 %v3901_v48, %v4576_v32  ;;  %v3903_v54 = vpop.eup %3902 }
 0x7dd   :  { %v4616_v53 = vadd.f32 %v2766_v52, %v2765_v4 }
 0x7df   :  { %3904 = vtanh.f32 %v4616_v53 }
 0x7e9   :  { %v3905_v55 = vpop.eup %3904 }
 0x7ea   :  { %v2769_v57 = vmul.f32 %v3905_v55, %v3903_v54  ;;  %v3227_v55 = vld [vmem:[#allocation6] sm:$0x1] }
 0x7ec   :  { %2770 = vst [vmem:[#allocation3 + $0x6] sm:$0x1] %v2769_v57  ;;  %v2773_v38 = vpack.c.bf16 %v2769_v57, %v2769_v57 }
 0x7ee   :  { %2999 = vmatmul.mubr.bf16.vlgmr.msra.gmra.mrb[32].mxu0 %v2773_v38  ;;  %3040 = vmatmul.mubr.bf16.vlgmr.msra.gmra.mrb[32].mxu1 %v2773_v38 }
 0x7ef   :  { %3610 = vmatpush3.bf16.msra.mxu0 %v3786_v58  ;;  %3625 = vmatprep.mubr.msk.bf16.mxu0 %vm4055_vm0, %v4053_v1  ;;  %v3243_v58 = vand.u32 127, %v131_v10 }
 0x7f0   :  { %3611 = vmatprep.subr.bf16.mxu0 %v4053_v1 }
 0x7f1   :  { %vm3244_vm1 = vcmp.lt.s32.totalorder %v3243_v58, 2 }
 0x7f3   :  { %3612 = vmatpush3.bf16.msra.mxu0 %v3787_v34 }
 0x7f4   :  { %3613 = vmatprep.subr.bf16.mxu0 %v4053_v1 }
 0x7f7   :  { %3614 = vmatpush3.bf16.msra.mxu0 %v3788_v59 }
 0x7f8   :  { %3615 = vmatprep.subr.bf16.mxu0 %v4053_v1 }
 0x7fb   :  { %3616 = vmatpush3.bf16.msra.mxu0 %v3789_v60 }
 0x7fc   :  { %3617 = vmatprep.subr.bf16.mxu0 %v4053_v1 }
 0x7ff   :  { %3618 = vmatpush3.bf16.msra.mxu0 %v3790_v30 }
 0x800   :  { %3619 = vmatprep.subr.bf16.mxu0 %v4053_v1 }
 0x803   :  { %3620 = vmatpush3.bf16.msra.mxu0 %v3791_v61 }
 0x804   :  { %3621 = vmatprep.subr.bf16.mxu0 %v4053_v1 }
 0x807   :  { %3622 = vmatpush3.bf16.msra.mxu0 %v3792_v62 }
 0x808   :  { %3623 = vmatprep.subr.bf16.mxu0 %v4053_v1 }
 0x80b   :  { %3624 = vmatpush3.bf16.msra.mxu0 %v3793_v63 }
 0x8c1   :  { %v3000_v2 = vpop.f32.mrb[32].mxu0  ;;  %v3041_v3 = vpop.f32.mrb[32].mxu1 }
 0x8c2   :  { %v3002_v5 = vpop.f32.mrb[33].mxu0  ;;  %v3043_v6 = vpop.f32.mrb[33].mxu1 }
 0x8c3   :  { %v3052_v7 = vcombine.low %v3000_v2, %v3002_v5  ;;  %v3053_v15 = vcombine.low %v3041_v3, %v3043_v6  ;;  %v3004_v56 = vpop.f32.mrb[34].mxu0  ;;  %v3045_v28 = vpop.f32.mrb[34].mxu1 }
 0x8c4   :  { %v3005_v29 = vpop.f32.mrb[35].mxu0  ;;  %v3046_v31 = vpop.f32.mrb[35].mxu1 }
 0x8c5   :  { %v3060_v32 = vrot.slane %v3052_v7, %v4302_v36  ;;  %v3067_v37 = vrot.slane %v3053_v15, %v4302_v36 }
 0x8c7   :  { %v3068_v33 = vcombine.low %v3060_v32, %v3067_v37 }
 0x8c9   :  { %v3075_v50 = vrot.slane %v3068_v33, %v4302_v36 }
 0x8cb   :  { %v3077_v1 = vadd.f32 %v3075_v50, %v2772_v51 }
 0x8cd   :  { %v3588_v0 = vmul.f32 -1.442695, %v3077_v1  ;;  %v3085_v35 = vrot.slane %v3077_v1, 1  ;;  %v3096_v8 = vrot.slane %v3077_v1, 3  ;;  %v3093_v13 = vrot.slane %v3077_v1, 2 }
 0x8cf   :  { %3906 = vpow2.f32 %v3588_v0  ;;  %v3589_v39 = vmul.f32 -1.442695, %v3085_v35  ;;  %v3590_v9 = vmul.f32 -1.442695, %v3096_v8 }
 0x8d1   :  { %3908 = vpow2.f32 %v3589_v39 }
 0x8d2   :  { %3910 = vpow2.f32 %v3590_v9 }
 0x8d9   :  { %v3907_v12 = vpop.eup %3906 }
 0x8da   :  { %v3081_v14 = vadd.f32 1.0, %v3907_v12 }
 0x8db   :  { %v3909_v16 = vpop.eup %3908 }
 0x8dc   :  { %3912 = vrcp.f32 %v3081_v14  ;;  %v3090_v17 = vadd.f32 1.0, %v3909_v16  ;;  %v3911_v18 = vpop.eup %3910 }
 0x8dd   :  { %3914 = vtanh.f32 %v3093_v13  ;;  %v3101_v21 = vadd.f32 1.0, %v3911_v18 }
 0x8de   :  { %3916 = vrcp.f32 %v3090_v17 }
 0x8df   :  { %3918 = vrcp.f32 %v3101_v21 }
 0x8e6   :  { %v3913_v36 = vpop.eup %3912 }
 0x8e7   :  { %v3915_v19 = vpop.eup %3914 }
 0x8e8   :  { %v3917_v20 = vpop.eup %3916  ;;  %v3105_v23 = vmul.f32 %v3915_v19, %v3913_v36 }
 0x8e9   :  { %v3104_v22 = vmul.f32 %v3917_v20, %v4616_v53  ;;  %v3919_v24 = vpop.eup %3918 }
 0x8eb   :  { %v3106_v11 = vadd.f32 %v3105_v23, %v3104_v22 }
 0x8ed   :  { %3920 = vtanh.f32 %v3106_v11  ;;  %3111 = vst [vmem:[#allocation5] sm:$0x1] %v3106_v11 }
 0x8f7   :  { %v3921_v25 = vpop.eup %3920 }
 0x8f8   :  { %v3108_v26 = vmul.f32 %v3921_v25, %v3919_v24 }
 0x8fa   :  { %3109 = vst [vmem:[#allocation3 + $0x7] sm:$0x1] %v3108_v26  ;;  %3110 = vst [vmem:[#allocation4] sm:$0x1] %v3108_v26 }
 0x901   :  { %v3112_v27 = vld [vmem:[#allocation3] sm:$0xff] }
 0x902   :  { %v3113_v40 = vpack.c.bf16 %v3112_v27, %v3112_v27 }
 0x904   :  { %3626 = vmatmul.mubr.bf16.vlgmr.msra.gmra.mrb[36].mxu0 %v3113_v40 }
 0x9d7   :  { %v3219_v42 = vpop.f32.mrb[36].mxu0 }
 0x9d8   :  { %v3220_v44 = vadd.f32 %v3591_v41, %v3219_v42  ;;  %v3627_v45 = vpop.f32.mrb[37].mxu0 }
 0x9d9   :  { %v3222_v46 = vpop.f32.mrb[38].mxu0 }
 0x9da   :  { %v3226_v47 = vmul.f32 %v3225_v43, %v3220_v44  ;;  %v3628_v48 = vpop.f32.mrb[39].mxu0 }
 0x9dc   :  { %v3228_v49 = vrot.slane %v3226_v47, 4 }
 0x9de   :  { %v3229_v4 = vadd.f32 %v3228_v49, %v3226_v47 }
 0x9e0   :  { %v3230_v52 = vrot.slane %v3229_v4, 2 }
 0x9e2   :  { %v3231_v53 = vadd.f32 %v3230_v52, %v3229_v4 }
 0x9e4   :  { %v3232_v54 = vrot.slane %v3231_v53, 1 }
 0x9e6   :  { %v3233_v57 = vadd.f32 %v3232_v54, %v3231_v53 }
 0x9e8   :  { %v3234_v38 = vadd.f32 %v3233_v57, %v3227_v55 }
 0x9ea   :  { %3235 = vst [vmem:[#allocation6] sm:$0x1] %v3234_v38 }
 0x9f1   :  { %v3239_v34 = vld [vmem:[#allocation6] sm:$0x1] }
 0x9f2   :  { %v3241_v59 = vmul.f32 0.125, %v3239_v34 }
 0x9f4   :  { %v3245_v60 = vsel %vm3244_vm1, %v3241_v59, -inf }
 0x9f5   :  { %v3247_v30 = vsel %vm3246_vm2, %v3245_v60, -inf }
 0x9f6   :  { %3248 = vmax.xlane.f32.xlu0 %v3247_v30 }
 0xa83   :  { %v3249_v61 = vpop.xlane.xlu0 %3248 }
 0xa84   :  { %v3250_v62 = vsub.f32 %v3241_v59, %v3249_v61 }
 0xa86   :  { %v3251_v63 = vmul.f32 1.442695, %v3250_v62 }
 0xa88   :  { %3922 = vpow2.f32 %v3251_v63 }
 0xa92   :  { %v3923_v2 = vpop.eup %3922 }
 0xa93   :  { %v3253_v3 = vsel %vm3244_vm1, %v3923_v2, 0.0 }
 0xa94   :  { %v3254_v5 = vsel %vm3246_vm2, %v3253_v3, 0.0 }
 0xa95   :  { %3255 = vadd.xlane.f32.xlu0 %v3254_v5 }
 0xb22   :  { %v3256_v6 = vpop.xlane.xlu0 %3255 }
 0xb23   :  { %3924 = vlog2.f32 %v3256_v6 }
 0xb2d   :  { %v3925_v7 = vpop.eup %3924 }
 0xb2e   :  { %v3258_v15 = vmul.f32 0.6931472, %v3925_v7 }
 0xb30   :  { %v3259_v10 = vadd.f32 %v3258_v15, %v3249_v61 }
 0xb32   :  { %v3260_v56 = vsub.f32 %v3241_v59, %v3259_v10 }
 0xb34   :  { %3261 = vst [vmem:[#allocation16] sm:$0x1] %v3260_v56 }
 0xb35   :  { %4025 = shalt.err (!%p4022_p8)
}
 0xb36   :  { %s4026_s1 = scalar_lea.hbm %s4658_s8, 16 }
 0xb37   :  { %p4027_p9 = scmp.ne.s32.totalorder %s4658_s8, %s4026_s1  ;;  %p4030_p10 = scmp.lt.u32.totalorder %s4026_s1, %s4658_s8 }
 0xb39   :  { %p4032_p11 = pnand %p4030_p10, %p4027_p9 }
 0xb3b   :  { %4035 = shalt.err (!%p4032_p11)
}
 0xb3c   :  { %3271 = dma.vmem_to_hbm [thread:$0]  %s3269_s7, 16, %s4658_s8, [#allocation10]  }
 0xb3d   :  { %4042 = dma.done.wait [#allocation10], 16  }
 0xb3e   :  { %4043 = vsyncadd [#allocation10], 4294967280 }
 0xb3f   :  { %3275 = vsyncpa [#allocation9], 1 }
 0xb40   :  { %3276 = vsyncpa [#allocation12], 1 }
 0xb41   :  { %3277 = vsyncpa [#allocation15], 1 }
 0xb42   :  { %3278 = vsyncpa [#allocation10], 1 }

</bundles_post_ra>
